<compile_context>
chip_gen: v7x
topology: tpu7x:2x2x1
jax: 0.10.0
libtpu: 0.0.40
codegen_flags: <defaults>
</compile_context>

<pallas_src>
import math

import jax
import jax.numpy as jnp
import numpy as np
from jax.experimental import pallas as pl
from jax.experimental.pallas import tpu as pltpu

COMMON_DIM = 256          # hardcoded in the PyTorch module
NUM_HEADS = 8
HEAD_DIM = COMMON_DIM // NUM_HEADS
FUSION_HIDDEN = 512
MAX_TILE_B = 512          # batch rows per grid step (~30 MiB live VMEM at 512)
VMEM_LIMIT_BYTES = 48 * 1024 * 1024   # > v5e/v6e scoped default, < v7x 64 MiB physical


def _round_up(x, m):
    return ((x + m - 1) // m) * m


def _make_fusion_kernel(num_modalities: int, tile_b: int):
    M, TB, E, H = num_modalities, tile_b, COMMON_DIM, NUM_HEADS
    bf16 = jnp.bfloat16

    def kernel(*refs):
        feat_refs = refs[0:M]
        pw_refs = refs[M:2 * M]
        pb_refs = refs[2 * M:3 * M]
        (wqkv_ref, bqkv_ref, w1_ref, b1_ref, w2_ref, b2_ref,
         hmask_ref, hexp_ref, out_ref, p_sc, qk_sc, ctx_sc) = refs[3 * M:]

        # ---- 1) per-modality projection straight into a bf16 VMEM slab
        #         (input widths differ -> one small-K dot each; no concat copy).
        for m in range(M):
            x = feat_refs[m][...].astype(bf16)
            p = (jnp.dot(x, pw_refs[m][...], preferred_element_type=jnp.float32)
                 + pb_refs[m][...])
            p_sc[m * TB:(m + 1) * TB, :] = p.astype(bf16)

        # ---- 2) fused Q/K/V: ONE (M*TB,256)@(256,768) matmul. The 1/sqrt(dh)
        #         scale is pre-folded into the Q columns/bias on the host.
        qkv = (jnp.dot(p_sc[...], wqkv_ref[...],
                       preferred_element_type=jnp.float32) + bqkv_ref[...])
        q = [qkv[m * TB:(m + 1) * TB, 0:E] for m in range(M)]
        k = [qkv[m * TB:(m + 1) * TB, E:2 * E] for m in range(M)]
        v = [qkv[m * TB:(m + 1) * TB, 2 * E:3 * E] for m in range(M)]

        # ---- 3) attention scores for ALL (query i, key j) pairs with ONE MXU
        #         dot: sublane-stack q_i*k_j products (bf16) and contract
        #         against the (E,H) block one-hot head mask (exact in bf16).
        for i in range(M):
            for j in range(M):
                qk_sc[(i * M + j) * TB:(i * M + j + 1) * TB, :] = \
                    (q[i] * k[j]).astype(bf16)
        s_all = jnp.dot(qk_sc[...], hmask_ref[...],
                        preferred_element_type=jnp.float32)       # (M*M*TB, H)

        def blk(t, i, j):
            return t[(i * M + j) * TB:(i * M + j + 1) * TB, :]

        # per-query max over the M key tokens
        mx = []
        for i in range(M):
            m_i = blk(s_all, i, 0)
            for j in range(1, M):
                m_i = jnp.maximum(m_i, blk(s_all, i, j))
            mx.append(m_i)

        # one long EUP exp burst over every (i, j) pair
        e_all = jnp.exp(jnp.concatenate(
            [blk(s_all, i, j) - mx[i] for i in range(M) for j in range(M)],
            axis=0))                                              # (M*M*TB, H)

        inv = []
        for i in range(M):
            d_i = blk(e_all, i, 0)
            for j in range(1, M):
                d_i = d_i + blk(e_all, i, j)
            inv.append(pl.reciprocal(d_i, approx=True))           # EUP slot

        # ---- 4) re-broadcast all softmax weights to lane width with ONE dot
        #         against the (H,E) expander, then per-query context on the VPU.
        p_all = jnp.concatenate(
            [blk(e_all, i, j) * inv[i] for i in range(M) for j in range(M)],
            axis=0).astype(bf16)                                  # (M*M*TB, H)
        p_wide = jnp.dot(p_all, hexp_ref[...],
                         preferred_element_type=jnp.float32)      # (M*M*TB, E)

        for i in range(M):
            c = blk(p_wide, i, 0) * v[0]
            for j in range(1, M):
                c = c + blk(p_wide, i, j) * v[j]
            ctx_sc[:, i * E:(i + 1) * E] = c.astype(bf16)         # lane block i

        # ---- 5) fusion MLP. The attention out-projection (wo, bo) is folded
        #         into w1/b1 on the host (exact since eval dropout = identity),
        #         so contexts feed the MLP directly: one K = M*E matmul + one
        #         K = FUSION_HIDDEN matmul. Output lanes are 128-padded.
        h1 = jnp.maximum(
            jnp.dot(ctx_sc[...], w1_ref[...], preferred_element_type=jnp.float32)
            + b1_ref[...], 0.0)
        out = (jnp.dot(h1.astype(bf16), w2_ref[...],
                       preferred_element_type=jnp.float32) + b2_ref[...])
        out_ref[...] = out.astype(out_ref.dtype)

    return kernel


def multimodal_fusion_encoder(features, params, feature_dims, out_dim):
    """Pallas TPU implementation of MultimodalFusionEncoder.forward (eval mode)."""
    modalities = list(feature_dims.keys())
    batch = next(iter(features.values())).shape[0]
    M, E = len(modalities), COMMON_DIM
    bf16 = jnp.bfloat16
    scale = 1.0 / math.sqrt(HEAD_DIM)

    # Batch tiling: multiple of 8 sublanes, capped for VMEM; when the batch is
    # big enough, pick a tile giving >=2 grid steps so both v7x TensorCores get
    # work on the "parallel" axis.
    if batch <= 8:
        tile_b = 8
    else:
        tile_b = min(MAX_TILE_B, _round_up((batch + 1) // 2, 8))
    padded = _round_up(batch, tile_b)
    grid = (padded // tile_b,)

    # Features + per-modality projectors. A missing modality substitutes
    # zeros(batch, 256) in the PyTorch forward (NOT the projector bias), so
    # zeroing the projector weights AND bias matches that exactly.
    feats, pws, pbs = [], [], []
    for m in modalities:
        pw = jnp.asarray(params["proj_w"][m], jnp.float32)
        pb = jnp.asarray(params["proj_b"][m], jnp.float32)
        if m in features:
            x = jnp.asarray(features[m], jnp.float32)
            # Padded rows are zeros -> finite scores, uniform softmax, sliced
            # off at the end (safe as long as no masking is added later).
            x = jnp.pad(x, ((0, padded - batch), (0, 0)))
            feats.append(x)
            pws.append(pw.astype(bf16))
            pbs.append(pb)
        else:
            feats.append(jnp.zeros((padded, feature_dims[m]), jnp.float32))
            pws.append(jnp.zeros_like(pw, dtype=bf16))
            pbs.append(jnp.zeros_like(pb))

    # ---- host-side weight fusion -------------------------------------------
    # (a) fold the attention scale into wq/bq; fuse Q/K/V into one (E, 3E).
    wqkv = jnp.concatenate(
        [jnp.asarray(params["wq"], jnp.float32) * scale,
         jnp.asarray(params["wk"], jnp.float32),
         jnp.asarray(params["wv"], jnp.float32)], axis=1).astype(bf16)
    bqkv = jnp.concatenate(
        [jnp.asarray(params["bq"], jnp.float32) * scale,
         jnp.asarray(params["bk"], jnp.float32),
         jnp.asarray(params["bv"], jnp.float32)], axis=1)
    # (b) fold the attention out-projection into the first fusion layer:
    #     flat @ w1 = sum_i (ctx_i @ wo + bo) @ w1_i == ctx_flat @ w1f + b1f.
    wo = jnp.asarray(params["wo"], jnp.float32)
    bo = jnp.asarray(params["bo"], jnp.float32)
    w1 = jnp.asarray(params["w1"], jnp.float32)
    b1 = jnp.asarray(params["b1"], jnp.float32)
    w1f = jnp.concatenate([wo @ w1[i * E:(i + 1) * E] for i in range(M)],
                          axis=0).astype(bf16)
    b1f = b1 + sum(bo @ w1[i * E:(i + 1) * E] for i in range(M))
    # (c) lane-dense output: pad out_dim to a multiple of 128, slice afterwards.
    out_dim_p = _round_up(out_dim, 128)
    w2 = jnp.pad(jnp.asarray(params["w2"], jnp.float32),
                 ((0, 0), (0, out_dim_p - out_dim))).astype(bf16)
    b2 = jnp.pad(jnp.asarray(params["b2"], jnp.float32),
                 ((0, 0), (0, out_dim_p - out_dim)))

    # (d) block one-hot head matrices (exact 0/1 in bf16): reduce q*k to
    #     per-head scores and re-broadcast softmax weights as single MXU dots.
    hm = np.zeros((E, NUM_HEADS), np.float32)
    for h in range(NUM_HEADS):
        hm[h * HEAD_DIM:(h + 1) * HEAD_DIM, h] = 1.0
    head_mask = jnp.asarray(hm, bf16)          # (E, H)
    head_expand = jnp.asarray(hm.T, bf16)      # (H, E)

    args = feats + pws + pbs + [wqkv, bqkv, w1f, b1f, w2, b2,
                                head_mask, head_expand]

    def tiled(d):
        return pl.BlockSpec((tile_b, d), lambda i: (i, 0))

    def resident(shape):                 # same block every grid step -> stays in VMEM
        return pl.BlockSpec(shape, lambda i: (0, 0))

    in_specs = (
        [tiled(feature_dims[m]) for m in modalities]
        + [resident((feature_dims[m], E)) for m in modalities]
        + [resident((1, E))] * M
        + [resident((E, 3 * E)), resident((1, 3 * E))]
        + [resident((M * E, FUSION_HIDDEN)), resident((1, FUSION_HIDDEN))]
        + [resident((FUSION_HIDDEN, out_dim_p)), resident((1, out_dim_p))]
        + [resident((E, NUM_HEADS)), resident((NUM_HEADS, E))]
    )

    kernel = _make_fusion_kernel(M, tile_b)
    out = pl.pallas_call(
        kernel,
        out_shape=jax.ShapeDtypeStruct((padded, out_dim_p), jnp.float32),
        grid=grid,
        in_specs=in_specs,
        out_specs=pl.BlockSpec((tile_b, out_dim_p), lambda i: (i, 0)),
        scratch_shapes=[
            pltpu.VMEM((M * tile_b, E), bf16),          # projected tokens (sublane slab)
            pltpu.VMEM((M * M * tile_b, E), bf16),      # q_i * k_j pair products
            pltpu.VMEM((tile_b, M * E), bf16),          # lane-concat attended contexts
        ],
        compiler_params=pltpu.CompilerParams(
            dimension_semantics=("parallel",),
            vmem_limit_bytes=VMEM_LIMIT_BYTES),
    )(*args)
    return out[:batch, :out_dim]


def init_params(key, feature_dims, out_dim):
    """Deterministic synthetic parameters (shapes follow the module's __init__)."""
    modalities = list(feature_dims.keys())
    M, E = len(modalities), COMMON_DIM
    ki = iter(jax.random.split(key, 2 * M + 12))

    def rnd(shape, scale):
        return jax.random.normal(next(ki), shape, jnp.float32) * scale

    params = {"proj_w": {}, "proj_b": {}}
    for m in modalities:
        d = feature_dims[m]
        params["proj_w"][m] = rnd((d, E), 1.0 / math.sqrt(d))
        params["proj_b"][m] = rnd((1, E), 0.02)
    for nm in ("wq", "wk", "wv", "wo"):
        params[nm] = rnd((E, E), 1.0 / math.sqrt(E))
    for nm in ("bq", "bk", "bv", "bo"):
        params[nm] = rnd((1, E), 0.02)
    params["w1"] = rnd((M * E, FUSION_HIDDEN), 1.0 / math.sqrt(M * E))
    params["b1"] = rnd((1, FUSION_HIDDEN), 0.02)
    params["w2"] = rnd((FUSION_HIDDEN, out_dim), 1.0 / math.sqrt(FUSION_HIDDEN))
    params["b2"] = rnd((1, out_dim), 0.02)
    return params


def reference_forward(features, params, feature_dims):
    """Pure-JAX f32 reference mirroring the PyTorch forward (eval mode)."""
    modalities = list(feature_dims.keys())
    batch = next(iter(features.values())).shape[0]
    E, H, Dh = COMMON_DIM, NUM_HEADS, HEAD_DIM
    M = len(modalities)

    proj = []
    for m in modalities:
        if m in features:
            proj.append(features[m] @ params["proj_w"][m] + params["proj_b"][m])
        else:
            proj.append(jnp.zeros((batch, E), jnp.float32))
    x = jnp.stack(proj, axis=1)                                # (B, M, E)

    q = x @ params["wq"] + params["bq"]
    k = x @ params["wk"] + params["bk"]
    v = x @ params["wv"] + params["bv"]

    def split(t):
        return t.reshape(batch, M, H, Dh).transpose(0, 2, 1, 3)

    qh, kh, vh = split(q), split(k), split(v)
    s = jnp.einsum("bhqd,bhkd->bhqk", qh, kh) / math.sqrt(Dh)
    p = jax.nn.softmax(s, axis=-1)
    o = jnp.einsum("bhqk,bhkd->bhqd", p, vh).transpose(0, 2, 1, 3).reshape(batch, M, E)
    o = o @ params["wo"] + params["bo"]
    flat = o.reshape(batch, M * E)
    h1 = jnp.maximum(flat @ params["w1"] + params["b1"], 0.0)
    return h1 @ params["w2"] + params["b2"]


if __name__ == "__main__":
    key = jax.random.PRNGKey(0)
    feature_dims = {"rgb": 32, "depth": 16, "proprio": 8}
    batch = 2
    out_dim = 512

    params = init_params(key, feature_dims, out_dim)

    fkey = jax.random.split(key, 2)[1]
    features = {}
    for i, (name, d) in enumerate(feature_dims.items()):
        features[name] = jax.random.normal(
            jax.random.fold_in(fkey, i), (batch, d), jnp.float32)

    out = multimodal_fusion_encoder(features, params, feature_dims, out_dim)
    out = jax.block_until_ready(out)
    assert out.shape == (batch, out_dim)

    # bf16-at-the-MXU (f32 accumulation) + host-side wo/scale folds vs the pure
    # f32 reference -> 5e-2 tolerance.
    ref = reference_forward(features, params, feature_dims)
    np.testing.assert_allclose(np.asarray(out), np.asarray(ref), rtol=5e-2, atol=5e-2)
    print("KERNEL_OK")
</pallas_src>

<mosaic_0001>
module attributes {stable_mosaic.version = 11 : i64} {
  func.func @kernel(%arg0: i32, %arg1: memref<8x32xf32, #tpu.memory_space<vmem>>, %arg2: memref<8x16xf32, #tpu.memory_space<vmem>>, %arg3: memref<8x8xf32, #tpu.memory_space<vmem>>, %arg4: memref<32x256xbf16, #tpu.memory_space<vmem>>, %arg5: memref<16x256xbf16, #tpu.memory_space<vmem>>, %arg6: memref<8x256xbf16, #tpu.memory_space<vmem>>, %arg7: memref<1x256xf32, #tpu.memory_space<vmem>>, %arg8: memref<1x256xf32, #tpu.memory_space<vmem>>, %arg9: memref<1x256xf32, #tpu.memory_space<vmem>>, %arg10: memref<256x768xbf16, #tpu.memory_space<vmem>>, %arg11: memref<1x768xf32, #tpu.memory_space<vmem>>, %arg12: memref<768x512xbf16, #tpu.memory_space<vmem>>, %arg13: memref<1x512xf32, #tpu.memory_space<vmem>>, %arg14: memref<512x512xbf16, #tpu.memory_space<vmem>>, %arg15: memref<1x512xf32, #tpu.memory_space<vmem>>, %arg16: memref<256x8xbf16, #tpu.memory_space<vmem>>, %arg17: memref<8x256xbf16, #tpu.memory_space<vmem>>, %arg18: memref<8x512xf32, #tpu.memory_space<vmem>>, %arg19: memref<24x256xbf16, #tpu.memory_space<vmem>>, %arg20: memref<72x256xbf16, #tpu.memory_space<vmem>>, %arg21: memref<8x768xbf16, #tpu.memory_space<vmem>>) attributes {dimension_semantics = [#tpu.dimension_semantics<parallel>], iteration_bounds = array<i64: 1>, scalar_prefetch = 0 : i64, scratch_operands = 3 : i64, tpu.core_type = #tpu.core_type<tc>, window_params = [{transform_indices = @transform_0, window_bounds = array<i64: 8, 32>}, {transform_indices = @transform_1, window_bounds = array<i64: 8, 16>}, {transform_indices = @transform_2, window_bounds = array<i64: 8, 8>}, {pipeline_mode = #tpu.pipeline_mode<synchronous>, transform_indices = @transform_3, window_bounds = array<i64: 32, 256>}, {pipeline_mode = #tpu.pipeline_mode<synchronous>, transform_indices = @transform_4, window_bounds = array<i64: 16, 256>}, {pipeline_mode = #tpu.pipeline_mode<synchronous>, transform_indices = @transform_5, window_bounds = array<i64: 8, 256>}, {pipeline_mode = #tpu.pipeline_mode<synchronous>, transform_indices = @transform_6, window_bounds = array<i64: 1, 256>}, {pipeline_mode = #tpu.pipeline_mode<synchronous>, transform_indices = @transform_7, window_bounds = array<i64: 1, 256>}, {pipeline_mode = #tpu.pipeline_mode<synchronous>, transform_indices = @transform_8, window_bounds = array<i64: 1, 256>}, {pipeline_mode = #tpu.pipeline_mode<synchronous>, transform_indices = @transform_9, window_bounds = array<i64: 256, 768>}, {pipeline_mode = #tpu.pipeline_mode<synchronous>, transform_indices = @transform_10, window_bounds = array<i64: 1, 768>}, {pipeline_mode = #tpu.pipeline_mode<synchronous>, transform_indices = @transform_11, window_bounds = array<i64: 768, 512>}, {pipeline_mode = #tpu.pipeline_mode<synchronous>, transform_indices = @transform_12, window_bounds = array<i64: 1, 512>}, {pipeline_mode = #tpu.pipeline_mode<synchronous>, transform_indices = @transform_13, window_bounds = array<i64: 512, 512>}, {pipeline_mode = #tpu.pipeline_mode<synchronous>, transform_indices = @transform_14, window_bounds = array<i64: 1, 512>}, {pipeline_mode = #tpu.pipeline_mode<synchronous>, transform_indices = @transform_15, window_bounds = array<i64: 256, 8>}, {pipeline_mode = #tpu.pipeline_mode<synchronous>, transform_indices = @transform_16, window_bounds = array<i64: 8, 256>}, {transform_indices = @transform_17, window_bounds = array<i64: 8, 512>}]} {
    %c0 = arith.constant 0 : index
    %c0_0 = arith.constant 0 : index
    %0 = vector.load %arg1[%c0, %c0_0] : memref<8x32xf32, #tpu.memory_space<vmem>>, vector<8x32xf32>
    %1 = arith.truncf %0 : vector<8x32xf32> to vector<8x32xbf16>
    %c0_1 = arith.constant 0 : index
    %c0_2 = arith.constant 0 : index
    %2 = vector.load %arg4[%c0_1, %c0_2] : memref<32x256xbf16, #tpu.memory_space<vmem>>, vector<32x256xbf16>
    %cst = arith.constant dense<0.000000e+00> : vector<8x256xf32>
    %3 = tpu.matmul %1, %2, %cst {dimension_numbers = #tpu.dot_dimension_numbers<[1], [0], [0], [1], [0, 0, 1, 1], [], []>} : vector<8x32xbf16>, vector<32x256xbf16>, vector<8x256xf32> -> vector<8x256xf32>
    %c0_3 = arith.constant 0 : index
    %c0_4 = arith.constant 0 : index
    %4 = vector.load %arg7[%c0_3, %c0_4] : memref<1x256xf32, #tpu.memory_space<vmem>>, vector<1x256xf32>
    %5 = vector.broadcast %4 : vector<1x256xf32> to vector<8x256xf32>
    %6 = arith.addf %3, %5 : vector<8x256xf32>
    %7 = arith.truncf %6 : vector<8x256xf32> to vector<8x256xbf16>
    %c0_5 = arith.constant 0 : index
    %c0_6 = arith.constant 0 : index
    %8 = vector.load %arg19[%c0_5, %c0_6] : memref<24x256xbf16, #tpu.memory_space<vmem>>, vector<8x256xbf16>
    tpu.vector_store %arg19[%c0_5, %c0_6], %7 {strides = array<i32>} : memref<24x256xbf16, #tpu.memory_space<vmem>>, vector<8x256xbf16>,
    %c0_7 = arith.constant 0 : index
    %c0_8 = arith.constant 0 : index
    %9 = vector.load %arg2[%c0_7, %c0_8] : memref<8x16xf32, #tpu.memory_space<vmem>>, vector<8x16xf32>
    %10 = arith.truncf %9 : vector<8x16xf32> to vector<8x16xbf16>
    %c0_9 = arith.constant 0 : index
    %c0_10 = arith.constant 0 : index
    %11 = vector.load %arg5[%c0_9, %c0_10] : memref<16x256xbf16, #tpu.memory_space<vmem>>, vector<16x256xbf16>
    %cst_11 = arith.constant dense<0.000000e+00> : vector<8x256xf32>
    %12 = tpu.matmul %10, %11, %cst_11 {dimension_numbers = #tpu.dot_dimension_numbers<[1], [0], [0], [1], [0, 0, 1, 1], [], []>} : vector<8x16xbf16>, vector<16x256xbf16>, vector<8x256xf32> -> vector<8x256xf32>
    %c0_12 = arith.constant 0 : index
    %c0_13 = arith.constant 0 : index
    %13 = vector.load %arg8[%c0_12, %c0_13] : memref<1x256xf32, #tpu.memory_space<vmem>>, vector<1x256xf32>
    %14 = vector.broadcast %13 : vector<1x256xf32> to vector<8x256xf32>
    %15 = arith.addf %12, %14 : vector<8x256xf32>
    %16 = arith.truncf %15 : vector<8x256xf32> to vector<8x256xbf16>
    %c8 = arith.constant 8 : index
    %c0_14 = arith.constant 0 : index
    %17 = vector.load %arg19[%c8, %c0_14] : memref<24x256xbf16, #tpu.memory_space<vmem>>, vector<8x256xbf16>
    tpu.vector_store %arg19[%c8, %c0_14], %16 {strides = array<i32>} : memref<24x256xbf16, #tpu.memory_space<vmem>>, vector<8x256xbf16>,
    %c0_15 = arith.constant 0 : index
    %c0_16 = arith.constant 0 : index
    %18 = vector.load %arg3[%c0_15, %c0_16] : memref<8x8xf32, #tpu.memory_space<vmem>>, vector<8x8xf32>
    %19 = arith.truncf %18 : vector<8x8xf32> to vector<8x8xbf16>
    %c0_17 = arith.constant 0 : index
    %c0_18 = arith.constant 0 : index
    %20 = vector.load %arg6[%c0_17, %c0_18] : memref<8x256xbf16, #tpu.memory_space<vmem>>, vector<8x256xbf16>
    %cst_19 = arith.constant dense<0.000000e+00> : vector<8x256xf32>
    %21 = tpu.matmul %19, %20, %cst_19 {dimension_numbers = #tpu.dot_dimension_numbers<[1], [0], [0], [1], [0, 0, 1, 1], [], []>} : vector<8x8xbf16>, vector<8x256xbf16>, vector<8x256xf32> -> vector<8x256xf32>
    %c0_20 = arith.constant 0 : index
    %c0_21 = arith.constant 0 : index
    %22 = vector.load %arg9[%c0_20, %c0_21] : memref<1x256xf32, #tpu.memory_space<vmem>>, vector<1x256xf32>
    %23 = vector.broadcast %22 : vector<1x256xf32> to vector<8x256xf32>
    %24 = arith.addf %21, %23 : vector<8x256xf32>
    %25 = arith.truncf %24 : vector<8x256xf32> to vector<8x256xbf16>
    %c16 = arith.constant 16 : index
    %c0_22 = arith.constant 0 : index
    %26 = vector.load %arg19[%c16, %c0_22] : memref<24x256xbf16, #tpu.memory_space<vmem>>, vector<8x256xbf16>
    tpu.vector_store %arg19[%c16, %c0_22], %25 {strides = array<i32>} : memref<24x256xbf16, #tpu.memory_space<vmem>>, vector<8x256xbf16>,
    %c0_23 = arith.constant 0 : index
    %c0_24 = arith.constant 0 : index
    %27 = vector.load %arg19[%c0_23, %c0_24] : memref<24x256xbf16, #tpu.memory_space<vmem>>, vector<24x256xbf16>
    %c0_25 = arith.constant 0 : index
    %c0_26 = arith.constant 0 : index
    %28 = vector.load %arg10[%c0_25, %c0_26] : memref<256x768xbf16, #tpu.memory_space<vmem>>, vector<256x768xbf16>
    %cst_27 = arith.constant dense<0.000000e+00> : vector<24x768xf32>
    %29 = tpu.matmul %27, %28, %cst_27 {dimension_numbers = #tpu.dot_dimension_numbers<[1], [0], [0], [1], [0, 0, 1, 1], [], []>} : vector<24x256xbf16>, vector<256x768xbf16>, vector<24x768xf32> -> vector<24x768xf32>
    %c0_28 = arith.constant 0 : index
    %c0_29 = arith.constant 0 : index
    %30 = vector.load %arg11[%c0_28, %c0_29] : memref<1x768xf32, #tpu.memory_space<vmem>>, vector<1x768xf32>
    %31 = vector.broadcast %30 : vector<1x768xf32> to vector<24x768xf32>
    %32 = arith.addf %29, %31 : vector<24x768xf32>
    %33 = vector.extract_strided_slice %32 {offsets = [0, 0], sizes = [8, 256], strides = [1, 1]} : vector<24x768xf32> to vector<8x256xf32>
    %34 = vector.extract_strided_slice %32 {offsets = [8, 0], sizes = [8, 256], strides = [1, 1]} : vector<24x768xf32> to vector<8x256xf32>
    %35 = vector.extract_strided_slice %32 {offsets = [16, 0], sizes = [8, 256], strides = [1, 1]} : vector<24x768xf32> to vector<8x256xf32>
    %36 = vector.extract_strided_slice %32 {offsets = [0, 256], sizes = [8, 256], strides = [1, 1]} : vector<24x768xf32> to vector<8x256xf32>
    %37 = vector.extract_strided_slice %32 {offsets = [8, 256], sizes = [8, 256], strides = [1, 1]} : vector<24x768xf32> to vector<8x256xf32>
    %38 = vector.extract_strided_slice %32 {offsets = [16, 256], sizes = [8, 256], strides = [1, 1]} : vector<24x768xf32> to vector<8x256xf32>
    %39 = vector.extract_strided_slice %32 {offsets = [0, 512], sizes = [8, 256], strides = [1, 1]} : vector<24x768xf32> to vector<8x256xf32>
    %40 = vector.extract_strided_slice %32 {offsets = [8, 512], sizes = [8, 256], strides = [1, 1]} : vector<24x768xf32> to vector<8x256xf32>
    %41 = vector.extract_strided_slice %32 {offsets = [16, 512], sizes = [8, 256], strides = [1, 1]} : vector<24x768xf32> to vector<8x256xf32>
    %42 = arith.mulf %33, %36 : vector<8x256xf32>
    %43 = arith.truncf %42 : vector<8x256xf32> to vector<8x256xbf16>
    %c0_30 = arith.constant 0 : index
    %c0_31 = arith.constant 0 : index
    %44 = vector.load %arg20[%c0_30, %c0_31] : memref<72x256xbf16, #tpu.memory_space<vmem>>, vector<8x256xbf16>
    tpu.vector_store %arg20[%c0_30, %c0_31], %43 {strides = array<i32>} : memref<72x256xbf16, #tpu.memory_space<vmem>>, vector<8x256xbf16>,
    %45 = arith.mulf %33, %37 : vector<8x256xf32>
    %46 = arith.truncf %45 : vector<8x256xf32> to vector<8x256xbf16>
    %c8_32 = arith.constant 8 : index
    %c0_33 = arith.constant 0 : index
    %47 = vector.load %arg20[%c8_32, %c0_33] : memref<72x256xbf16, #tpu.memory_space<vmem>>, vector<8x256xbf16>
    tpu.vector_store %arg20[%c8_32, %c0_33], %46 {strides = array<i32>} : memref<72x256xbf16, #tpu.memory_space<vmem>>, vector<8x256xbf16>,
    %48 = arith.mulf %33, %38 : vector<8x256xf32>
    %49 = arith.truncf %48 : vector<8x256xf32> to vector<8x256xbf16>
    %c16_34 = arith.constant 16 : index
    %c0_35 = arith.constant 0 : index
    %50 = vector.load %arg20[%c16_34, %c0_35] : memref<72x256xbf16, #tpu.memory_space<vmem>>, vector<8x256xbf16>
    tpu.vector_store %arg20[%c16_34, %c0_35], %49 {strides = array<i32>} : memref<72x256xbf16, #tpu.memory_space<vmem>>, vector<8x256xbf16>,
    %51 = arith.mulf %34, %36 : vector<8x256xf32>
    %52 = arith.truncf %51 : vector<8x256xf32> to vector<8x256xbf16>
    %c24 = arith.constant 24 : index
    %c0_36 = arith.constant 0 : index
    %53 = vector.load %arg20[%c24, %c0_36] : memref<72x256xbf16, #tpu.memory_space<vmem>>, vector<8x256xbf16>
    tpu.vector_store %arg20[%c24, %c0_36], %52 {strides = array<i32>} : memref<72x256xbf16, #tpu.memory_space<vmem>>, vector<8x256xbf16>,
    %54 = arith.mulf %34, %37 : vector<8x256xf32>
    %55 = arith.truncf %54 : vector<8x256xf32> to vector<8x256xbf16>
    %c32 = arith.constant 32 : index
    %c0_37 = arith.constant 0 : index
    %56 = vector.load %arg20[%c32, %c0_37] : memref<72x256xbf16, #tpu.memory_space<vmem>>, vector<8x256xbf16>
    tpu.vector_store %arg20[%c32, %c0_37], %55 {strides = array<i32>} : memref<72x256xbf16, #tpu.memory_space<vmem>>, vector<8x256xbf16>,
    %57 = arith.mulf %34, %38 : vector<8x256xf32>
    %58 = arith.truncf %57 : vector<8x256xf32> to vector<8x256xbf16>
    %c40 = arith.constant 40 : index
    %c0_38 = arith.constant 0 : index
    %59 = vector.load %arg20[%c40, %c0_38] : memref<72x256xbf16, #tpu.memory_space<vmem>>, vector<8x256xbf16>
    tpu.vector_store %arg20[%c40, %c0_38], %58 {strides = array<i32>} : memref<72x256xbf16, #tpu.memory_space<vmem>>, vector<8x256xbf16>,
    %60 = arith.mulf %35, %36 : vector<8x256xf32>
    %61 = arith.truncf %60 : vector<8x256xf32> to vector<8x256xbf16>
    %c48 = arith.constant 48 : index
    %c0_39 = arith.constant 0 : index
    %62 = vector.load %arg20[%c48, %c0_39] : memref<72x256xbf16, #tpu.memory_space<vmem>>, vector<8x256xbf16>
    tpu.vector_store %arg20[%c48, %c0_39], %61 {strides = array<i32>} : memref<72x256xbf16, #tpu.memory_space<vmem>>, vector<8x256xbf16>,
    %63 = arith.mulf %35, %37 : vector<8x256xf32>
    %64 = arith.truncf %63 : vector<8x256xf32> to vector<8x256xbf16>
    %c56 = arith.constant 56 : index
    %c0_40 = arith.constant 0 : index
    %65 = vector.load %arg20[%c56, %c0_40] : memref<72x256xbf16, #tpu.memory_space<vmem>>, vector<8x256xbf16>
    tpu.vector_store %arg20[%c56, %c0_40], %64 {strides = array<i32>} : memref<72x256xbf16, #tpu.memory_space<vmem>>, vector<8x256xbf16>,
    %66 = arith.mulf %35, %38 : vector<8x256xf32>
    %67 = arith.truncf %66 : vector<8x256xf32> to vector<8x256xbf16>
    %c64 = arith.constant 64 : index
    %c0_41 = arith.constant 0 : index
    %68 = vector.load %arg20[%c64, %c0_41] : memref<72x256xbf16, #tpu.memory_space<vmem>>, vector<8x256xbf16>
    tpu.vector_store %arg20[%c64, %c0_41], %67 {strides = array<i32>} : memref<72x256xbf16, #tpu.memory_space<vmem>>, vector<8x256xbf16>,
    %c0_42 = arith.constant 0 : index
    %c0_43 = arith.constant 0 : index
    %69 = vector.load %arg20[%c0_42, %c0_43] : memref<72x256xbf16, #tpu.memory_space<vmem>>, vector<72x256xbf16>
    %c0_44 = arith.constant 0 : index
    %c0_45 = arith.constant 0 : index
    %70 = vector.load %arg16[%c0_44, %c0_45] : memref<256x8xbf16, #tpu.memory_space<vmem>>, vector<256x8xbf16>
    %cst_46 = arith.constant dense<0.000000e+00> : vector<72x8xf32>
    %71 = tpu.matmul %69, %70, %cst_46 {dimension_numbers = #tpu.dot_dimension_numbers<[1], [0], [0], [1], [0, 0, 1, 1], [], []>} : vector<72x256xbf16>, vector<256x8xbf16>, vector<72x8xf32> -> vector<72x8xf32>
    %72 = vector.extract_strided_slice %71 {offsets = [0, 0], sizes = [8, 8], strides = [1, 1]} : vector<72x8xf32> to vector<8x8xf32>
    %73 = vector.extract_strided_slice %71 {offsets = [8, 0], sizes = [8, 8], strides = [1, 1]} : vector<72x8xf32> to vector<8x8xf32>
    %74 = arith.maximumf %72, %73 : vector<8x8xf32>
    %75 = vector.extract_strided_slice %71 {offsets = [16, 0], sizes = [8, 8], strides = [1, 1]} : vector<72x8xf32> to vector<8x8xf32>
    %76 = arith.maximumf %74, %75 : vector<8x8xf32>
    %77 = vector.extract_strided_slice %71 {offsets = [24, 0], sizes = [8, 8], strides = [1, 1]} : vector<72x8xf32> to vector<8x8xf32>
    %78 = vector.extract_strided_slice %71 {offsets = [32, 0], sizes = [8, 8], strides = [1, 1]} : vector<72x8xf32> to vector<8x8xf32>
    %79 = arith.maximumf %77, %78 : vector<8x8xf32>
    %80 = vector.extract_strided_slice %71 {offsets = [40, 0], sizes = [8, 8], strides = [1, 1]} : vector<72x8xf32> to vector<8x8xf32>
    %81 = arith.maximumf %79, %80 : vector<8x8xf32>
    %82 = vector.extract_strided_slice %71 {offsets = [48, 0], sizes = [8, 8], strides = [1, 1]} : vector<72x8xf32> to vector<8x8xf32>
    %83 = vector.extract_strided_slice %71 {offsets = [56, 0], sizes = [8, 8], strides = [1, 1]} : vector<72x8xf32> to vector<8x8xf32>
    %84 = arith.maximumf %82, %83 : vector<8x8xf32>
    %85 = vector.extract_strided_slice %71 {offsets = [64, 0], sizes = [8, 8], strides = [1, 1]} : vector<72x8xf32> to vector<8x8xf32>
    %86 = arith.maximumf %84, %85 : vector<8x8xf32>
    %87 = vector.extract_strided_slice %71 {offsets = [0, 0], sizes = [8, 8], strides = [1, 1]} : vector<72x8xf32> to vector<8x8xf32>
    %88 = arith.subf %87, %76 : vector<8x8xf32>
    %89 = vector.extract_strided_slice %71 {offsets = [8, 0], sizes = [8, 8], strides = [1, 1]} : vector<72x8xf32> to vector<8x8xf32>
    %90 = arith.subf %89, %76 : vector<8x8xf32>
    %91 = vector.extract_strided_slice %71 {offsets = [16, 0], sizes = [8, 8], strides = [1, 1]} : vector<72x8xf32> to vector<8x8xf32>
    %92 = arith.subf %91, %76 : vector<8x8xf32>
    %93 = vector.extract_strided_slice %71 {offsets = [24, 0], sizes = [8, 8], strides = [1, 1]} : vector<72x8xf32> to vector<8x8xf32>
    %94 = arith.subf %93, %81 : vector<8x8xf32>
    %95 = vector.extract_strided_slice %71 {offsets = [32, 0], sizes = [8, 8], strides = [1, 1]} : vector<72x8xf32> to vector<8x8xf32>
    %96 = arith.subf %95, %81 : vector<8x8xf32>
    %97 = vector.extract_strided_slice %71 {offsets = [40, 0], sizes = [8, 8], strides = [1, 1]} : vector<72x8xf32> to vector<8x8xf32>
    %98 = arith.subf %97, %81 : vector<8x8xf32>
    %99 = vector.extract_strided_slice %71 {offsets = [48, 0], sizes = [8, 8], strides = [1, 1]} : vector<72x8xf32> to vector<8x8xf32>
    %100 = arith.subf %99, %86 : vector<8x8xf32>
    %101 = vector.extract_strided_slice %71 {offsets = [56, 0], sizes = [8, 8], strides = [1, 1]} : vector<72x8xf32> to vector<8x8xf32>
    %102 = arith.subf %101, %86 : vector<8x8xf32>
    %103 = vector.extract_strided_slice %71 {offsets = [64, 0], sizes = [8, 8], strides = [1, 1]} : vector<72x8xf32> to vector<8x8xf32>
    %104 = arith.subf %103, %86 : vector<8x8xf32>
    %105 = tpu.concatenate %88, %90, %92, %94, %96, %98, %100, %102, %104 in 0 : vector<8x8xf32>, vector<8x8xf32>, vector<8x8xf32>, vector<8x8xf32>, vector<8x8xf32>, vector<8x8xf32>, vector<8x8xf32>, vector<8x8xf32>, vector<8x8xf32> -> vector<72x8xf32>
    %106 = math.exp %105 : vector<72x8xf32>
    %107 = vector.extract_strided_slice %106 {offsets = [0, 0], sizes = [8, 8], strides = [1, 1]} : vector<72x8xf32> to vector<8x8xf32>
    %108 = vector.extract_strided_slice %106 {offsets = [8, 0], sizes = [8, 8], strides = [1, 1]} : vector<72x8xf32> to vector<8x8xf32>
    %109 = arith.addf %107, %108 : vector<8x8xf32>
    %110 = vector.extract_strided_slice %106 {offsets = [16, 0], sizes = [8, 8], strides = [1, 1]} : vector<72x8xf32> to vector<8x8xf32>
    %111 = arith.addf %109, %110 : vector<8x8xf32>
    %112 = tpu.reciprocal %111 {approx = true} : vector<8x8xf32> -> vector<8x8xf32>
    %113 = vector.extract_strided_slice %106 {offsets = [24, 0], sizes = [8, 8], strides = [1, 1]} : vector<72x8xf32> to vector<8x8xf32>
    %114 = vector.extract_strided_slice %106 {offsets = [32, 0], sizes = [8, 8], strides = [1, 1]} : vector<72x8xf32> to vector<8x8xf32>
    %115 = arith.addf %113, %114 : vector<8x8xf32>
    %116 = vector.extract_strided_slice %106 {offsets = [40, 0], sizes = [8, 8], strides = [1, 1]} : vector<72x8xf32> to vector<8x8xf32>
    %117 = arith.addf %115, %116 : vector<8x8xf32>
    %118 = tpu.reciprocal %117 {approx = true} : vector<8x8xf32> -> vector<8x8xf32>
    %119 = vector.extract_strided_slice %106 {offsets = [48, 0], sizes = [8, 8], strides = [1, 1]} : vector<72x8xf32> to vector<8x8xf32>
    %120 = vector.extract_strided_slice %106 {offsets = [56, 0], sizes = [8, 8], strides = [1, 1]} : vector<72x8xf32> to vector<8x8xf32>
    %121 = arith.addf %119, %120 : vector<8x8xf32>
    %122 = vector.extract_strided_slice %106 {offsets = [64, 0], sizes = [8, 8], strides = [1, 1]} : vector<72x8xf32> to vector<8x8xf32>
    %123 = arith.addf %121, %122 : vector<8x8xf32>
    %124 = tpu.reciprocal %123 {approx = true} : vector<8x8xf32> -> vector<8x8xf32>
    %125 = vector.extract_strided_slice %106 {offsets = [0, 0], sizes = [8, 8], strides = [1, 1]} : vector<72x8xf32> to vector<8x8xf32>
    %126 = arith.mulf %125, %112 : vector<8x8xf32>
    %127 = vector.extract_strided_slice %106 {offsets = [8, 0], sizes = [8, 8], strides = [1, 1]} : vector<72x8xf32> to vector<8x8xf32>
    %128 = arith.mulf %127, %112 : vector<8x8xf32>
    %129 = vector.extract_strided_slice %106 {offsets = [16, 0], sizes = [8, 8], strides = [1, 1]} : vector<72x8xf32> to vector<8x8xf32>
    %130 = arith.mulf %129, %112 : vector<8x8xf32>
    %131 = vector.extract_strided_slice %106 {offsets = [24, 0], sizes = [8, 8], strides = [1, 1]} : vector<72x8xf32> to vector<8x8xf32>
    %132 = arith.mulf %131, %118 : vector<8x8xf32>
    %133 = vector.extract_strided_slice %106 {offsets = [32, 0], sizes = [8, 8], strides = [1, 1]} : vector<72x8xf32> to vector<8x8xf32>
    %134 = arith.mulf %133, %118 : vector<8x8xf32>
    %135 = vector.extract_strided_slice %106 {offsets = [40, 0], sizes = [8, 8], strides = [1, 1]} : vector<72x8xf32> to vector<8x8xf32>
    %136 = arith.mulf %135, %118 : vector<8x8xf32>
    %137 = vector.extract_strided_slice %106 {offsets = [48, 0], sizes = [8, 8], strides = [1, 1]} : vector<72x8xf32> to vector<8x8xf32>
    %138 = arith.mulf %137, %124 : vector<8x8xf32>
    %139 = vector.extract_strided_slice %106 {offsets = [56, 0], sizes = [8, 8], strides = [1, 1]} : vector<72x8xf32> to vector<8x8xf32>
    %140 = arith.mulf %139, %124 : vector<8x8xf32>
    %141 = vector.extract_strided_slice %106 {offsets = [64, 0], sizes = [8, 8], strides = [1, 1]} : vector<72x8xf32> to vector<8x8xf32>
    %142 = arith.mulf %141, %124 : vector<8x8xf32>
    %143 = tpu.concatenate %126, %128, %130, %132, %134, %136, %138, %140, %142 in 0 : vector<8x8xf32>, vector<8x8xf32>, vector<8x8xf32>, vector<8x8xf32>, vector<8x8xf32>, vector<8x8xf32>, vector<8x8xf32>, vector<8x8xf32>, vector<8x8xf32> -> vector<72x8xf32>
    %144 = arith.truncf %143 : vector<72x8xf32> to vector<72x8xbf16>
    %c0_47 = arith.constant 0 : index
    %c0_48 = arith.constant 0 : index
    %145 = vector.load %arg17[%c0_47, %c0_48] : memref<8x256xbf16, #tpu.memory_space<vmem>>, vector<8x256xbf16>
    %cst_49 = arith.constant dense<0.000000e+00> : vector<72x256xf32>
    %146 = tpu.matmul %144, %145, %cst_49 {dimension_numbers = #tpu.dot_dimension_numbers<[1], [0], [0], [1], [0, 0, 1, 1], [], []>} : vector<72x8xbf16>, vector<8x256xbf16>, vector<72x256xf32> -> vector<72x256xf32>
    %147 = vector.extract_strided_slice %146 {offsets = [0, 0], sizes = [8, 256], strides = [1, 1]} : vector<72x256xf32> to vector<8x256xf32>
    %148 = arith.mulf %147, %39 : vector<8x256xf32>
    %149 = vector.extract_strided_slice %146 {offsets = [8, 0], sizes = [8, 256], strides = [1, 1]} : vector<72x256xf32> to vector<8x256xf32>
    %150 = arith.mulf %149, %40 : vector<8x256xf32>
    %151 = arith.addf %148, %150 : vector<8x256xf32>
    %152 = vector.extract_strided_slice %146 {offsets = [16, 0], sizes = [8, 256], strides = [1, 1]} : vector<72x256xf32> to vector<8x256xf32>
    %153 = arith.mulf %152, %41 : vector<8x256xf32>
    %154 = arith.addf %151, %153 : vector<8x256xf32>
    %155 = arith.truncf %154 : vector<8x256xf32> to vector<8x256xbf16>
    %c0_50 = arith.constant 0 : index
    %c0_51 = arith.constant 0 : index
    %156 = vector.load %arg21[%c0_50, %c0_51] : memref<8x768xbf16, #tpu.memory_space<vmem>>, vector<8x256xbf16>
    tpu.vector_store %arg21[%c0_50, %c0_51], %155 {strides = array<i32>} : memref<8x768xbf16, #tpu.memory_space<vmem>>, vector<8x256xbf16>,
    %157 = vector.extract_strided_slice %146 {offsets = [24, 0], sizes = [8, 256], strides = [1, 1]} : vector<72x256xf32> to vector<8x256xf32>
    %158 = arith.mulf %157, %39 : vector<8x256xf32>
    %159 = vector.extract_strided_slice %146 {offsets = [32, 0], sizes = [8, 256], strides = [1, 1]} : vector<72x256xf32> to vector<8x256xf32>
    %160 = arith.mulf %159, %40 : vector<8x256xf32>
    %161 = arith.addf %158, %160 : vector<8x256xf32>
    %162 = vector.extract_strided_slice %146 {offsets = [40, 0], sizes = [8, 256], strides = [1, 1]} : vector<72x256xf32> to vector<8x256xf32>
    %163 = arith.mulf %162, %41 : vector<8x256xf32>
    %164 = arith.addf %161, %163 : vector<8x256xf32>
    %165 = arith.truncf %164 : vector<8x256xf32> to vector<8x256xbf16>
    %c0_52 = arith.constant 0 : index
    %c256 = arith.constant 256 : index
    %166 = vector.load %arg21[%c0_52, %c256] : memref<8x768xbf16, #tpu.memory_space<vmem>>, vector<8x256xbf16>
    tpu.vector_store %arg21[%c0_52, %c256], %165 {strides = array<i32>} : memref<8x768xbf16, #tpu.memory_space<vmem>>, vector<8x256xbf16>,
    %167 = vector.extract_strided_slice %146 {offsets = [48, 0], sizes = [8, 256], strides = [1, 1]} : vector<72x256xf32> to vector<8x256xf32>
    %168 = arith.mulf %167, %39 : vector<8x256xf32>
    %169 = vector.extract_strided_slice %146 {offsets = [56, 0], sizes = [8, 256], strides = [1, 1]} : vector<72x256xf32> to vector<8x256xf32>
    %170 = arith.mulf %169, %40 : vector<8x256xf32>
    %171 = arith.addf %168, %170 : vector<8x256xf32>
    %172 = vector.extract_strided_slice %146 {offsets = [64, 0], sizes = [8, 256], strides = [1, 1]} : vector<72x256xf32> to vector<8x256xf32>
    %173 = arith.mulf %172, %41 : vector<8x256xf32>
    %174 = arith.addf %171, %173 : vector<8x256xf32>
    %175 = arith.truncf %174 : vector<8x256xf32> to vector<8x256xbf16>
    %c0_53 = arith.constant 0 : index
    %c512 = arith.constant 512 : index
    %176 = vector.load %arg21[%c0_53, %c512] : memref<8x768xbf16, #tpu.memory_space<vmem>>, vector<8x256xbf16>
    tpu.vector_store %arg21[%c0_53, %c512], %175 {strides = array<i32>} : memref<8x768xbf16, #tpu.memory_space<vmem>>, vector<8x256xbf16>,
    %c0_54 = arith.constant 0 : index
    %c0_55 = arith.constant 0 : index
    %177 = vector.load %arg21[%c0_54, %c0_55] : memref<8x768xbf16, #tpu.memory_space<vmem>>, vector<8x768xbf16>
    %c0_56 = arith.constant 0 : index
    %c0_57 = arith.constant 0 : index
    %178 = vector.load %arg12[%c0_56, %c0_57] : memref<768x512xbf16, #tpu.memory_space<vmem>>, vector<768x512xbf16>
    %cst_58 = arith.constant dense<0.000000e+00> : vector<8x512xf32>
    %179 = tpu.matmul %177, %178, %cst_58 {dimension_numbers = #tpu.dot_dimension_numbers<[1], [0], [0], [1], [0, 0, 1, 1], [], []>} : vector<8x768xbf16>, vector<768x512xbf16>, vector<8x512xf32> -> vector<8x512xf32>
    %c0_59 = arith.constant 0 : index
    %c0_60 = arith.constant 0 : index
    %180 = vector.load %arg13[%c0_59, %c0_60] : memref<1x512xf32, #tpu.memory_space<vmem>>, vector<1x512xf32>
    %181 = vector.broadcast %180 : vector<1x512xf32> to vector<8x512xf32>
    %182 = arith.addf %179, %181 : vector<8x512xf32>
    %cst_61 = arith.constant 0.000000e+00 : f32
    %183 = vector.broadcast %cst_61 : f32 to vector<8x512xf32>
    %184 = arith.maximumf %182, %183 : vector<8x512xf32>
    %185 = arith.truncf %184 : vector<8x512xf32> to vector<8x512xbf16>
    %c0_62 = arith.constant 0 : index
    %c0_63 = arith.constant 0 : index
    %186 = vector.load %arg14[%c0_62, %c0_63] : memref<512x512xbf16, #tpu.memory_space<vmem>>, vector<512x512xbf16>
    %cst_64 = arith.constant dense<0.000000e+00> : vector<8x512xf32>
    %187 = tpu.matmul %185, %186, %cst_64 {dimension_numbers = #tpu.dot_dimension_numbers<[1], [0], [0], [1], [0, 0, 1, 1], [], []>} : vector<8x512xbf16>, vector<512x512xbf16>, vector<8x512xf32> -> vector<8x512xf32>
    %c0_65 = arith.constant 0 : index
    %c0_66 = arith.constant 0 : index
    %188 = vector.load %arg15[%c0_65, %c0_66] : memref<1x512xf32, #tpu.memory_space<vmem>>, vector<1x512xf32>
    %189 = vector.broadcast %188 : vector<1x512xf32> to vector<8x512xf32>
    %190 = arith.addf %187, %189 : vector<8x512xf32>
    %c0_67 = arith.constant 0 : index
    %c0_68 = arith.constant 0 : index
    %191 = vector.load %arg18[%c0_67, %c0_68] : memref<8x512xf32, #tpu.memory_space<vmem>>, vector<8x512xf32>
    tpu.vector_store %arg18[%c0_67, %c0_68], %190 {strides = array<i32>} : memref<8x512xf32, #tpu.memory_space<vmem>>, vector<8x512xf32>,
    return
  }
  func.func @transform_0(%arg0: i32) -> (i32, i32) {
    %c0_i32 = arith.constant 0 : i32
    %c0_i32_0 = arith.constant 0 : i32
    return %arg0, %c0_i32 : i32, i32
  }
  func.func @transform_1(%arg0: i32) -> (i32, i32) {
    %c0_i32 = arith.constant 0 : i32
    %c0_i32_0 = arith.constant 0 : i32
    return %arg0, %c0_i32 : i32, i32
  }
  func.func @transform_2(%arg0: i32) -> (i32, i32) {
    %c0_i32 = arith.constant 0 : i32
    %c0_i32_0 = arith.constant 0 : i32
    return %arg0, %c0_i32 : i32, i32
  }
  func.func @transform_3(%arg0: i32) -> (i32, i32) {
    %c0_i32 = arith.constant 0 : i32
    %c0_i32_0 = arith.constant 0 : i32
    %c0_i32_1 = arith.constant 0 : i32
    return %c0_i32, %c0_i32_0 : i32, i32
  }
  func.func @transform_4(%arg0: i32) -> (i32, i32) {
    %c0_i32 = arith.constant 0 : i32
    %c0_i32_0 = arith.constant 0 : i32
    %c0_i32_1 = arith.constant 0 : i32
    return %c0_i32, %c0_i32_0 : i32, i32
  }
  func.func @transform_5(%arg0: i32) -> (i32, i32) {
    %c0_i32 = arith.constant 0 : i32
    %c0_i32_0 = arith.constant 0 : i32
    %c0_i32_1 = arith.constant 0 : i32
    return %c0_i32, %c0_i32_0 : i32, i32
  }
  func.func @transform_6(%arg0: i32) -> (i32, i32) {
    %c0_i32 = arith.constant 0 : i32
    %c0_i32_0 = arith.constant 0 : i32
    %c0_i32_1 = arith.constant 0 : i32
    return %c0_i32, %c0_i32_0 : i32, i32
  }
  func.func @transform_7(%arg0: i32) -> (i32, i32) {
    %c0_i32 = arith.constant 0 : i32
    %c0_i32_0 = arith.constant 0 : i32
    %c0_i32_1 = arith.constant 0 : i32
    return %c0_i32, %c0_i32_0 : i32, i32
  }
  func.func @transform_8(%arg0: i32) -> (i32, i32) {
    %c0_i32 = arith.constant 0 : i32
    %c0_i32_0 = arith.constant 0 : i32
    %c0_i32_1 = arith.constant 0 : i32
    return %c0_i32, %c0_i32_0 : i32, i32
  }
  func.func @transform_9(%arg0: i32) -> (i32, i32) {
    %c0_i32 = arith.constant 0 : i32
    %c0_i32_0 = arith.constant 0 : i32
    %c0_i32_1 = arith.constant 0 : i32
    return %c0_i32, %c0_i32_0 : i32, i32
  }
  func.func @transform_10(%arg0: i32) -> (i32, i32) {
    %c0_i32 = arith.constant 0 : i32
    %c0_i32_0 = arith.constant 0 : i32
    %c0_i32_1 = arith.constant 0 : i32
    return %c0_i32, %c0_i32_0 : i32, i32
  }
  func.func @transform_11(%arg0: i32) -> (i32, i32) {
    %c0_i32 = arith.constant 0 : i32
    %c0_i32_0 = arith.constant 0 : i32
    %c0_i32_1 = arith.constant 0 : i32
    return %c0_i32, %c0_i32_0 : i32, i32
  }
  func.func @transform_12(%arg0: i32) -> (i32, i32) {
    %c0_i32 = arith.constant 0 : i32
    %c0_i32_0 = arith.constant 0 : i32
    %c0_i32_1 = arith.constant 0 : i32
    return %c0_i32, %c0_i32_0 : i32, i32
  }
  func.func @transform_13(%arg0: i32) -> (i32, i32) {
    %c0_i32 = arith.constant 0 : i32
    %c0_i32_0 = arith.constant 0 : i32
    %c0_i32_1 = arith.constant 0 : i32
    return %c0_i32, %c0_i32_0 : i32, i32
  }
  func.func @transform_14(%arg0: i32) -> (i32, i32) {
    %c0_i32 = arith.constant 0 : i32
    %c0_i32_0 = arith.constant 0 : i32
    %c0_i32_1 = arith.constant 0 : i32
    return %c0_i32, %c0_i32_0 : i32, i32
  }
  func.func @transform_15(%arg0: i32) -> (i32, i32) {
    %c0_i32 = arith.constant 0 : i32
    %c0_i32_0 = arith.constant 0 : i32
    %c0_i32_1 = arith.constant 0 : i32
    return %c0_i32, %c0_i32_0 : i32, i32
  }
  func.func @transform_16(%arg0: i32) -> (i32, i32) {
    %c0_i32 = arith.constant 0 : i32
    %c0_i32_0 = arith.constant 0 : i32
    %c0_i32_1 = arith.constant 0 : i32
    return %c0_i32, %c0_i32_0 : i32, i32
  }
  func.func @transform_17(%arg0: i32) -> (i32, i32) {
    %c0_i32 = arith.constant 0 : i32
    %c0_i32_0 = arith.constant 0 : i32
    return %arg0, %c0_i32 : i32, i32
  }
}

</mosaic_0001>

<bundles_post_ra>
// kernel: tpu_custom_call.1
= control target key start
LH: loop header
LB: loop body
LE: loop exit
PB: predicated region body
PF: predicated region fallthrough
CT: control target
= control target key end

     0   :  { %s5911_s0 = inlined_call_operand.vmem [shape: f32[8,32], index: 0, kind: input, shape index: {}]   ;;  %s5912_s1 = inlined_call_operand.vmem [shape: f32[8,16], index: 1, kind: input, shape index: {}]   ;;  %s5913_s2 = inlined_call_operand.vmem [shape: f32[8,8], index: 2, kind: input, shape index: {}]   ;;  %s5914_s3 = inlined_call_operand.vmem [shape: bf16[32,256], index: 3, kind: input, shape index: {}]   ;;  %s5915_s4 = inlined_call_operand.vmem [shape: bf16[16,256], index: 4, kind: input, shape index: {}]   ;;  %s5916_s5 = inlined_call_operand.vmem [shape: bf16[8,256], index: 5, kind: input, shape index: {}]   ;;  %s5917_s6 = inlined_call_operand.vmem [shape: f32[1,256], index: 6, kind: input, shape index: {}]   ;;  %s5918_s7 = inlined_call_operand.vmem [shape: f32[1,256], index: 7, kind: input, shape index: {}]   ;;  %s5919_s8 = inlined_call_operand.vmem [shape: f32[1,256], index: 8, kind: input, shape index: {}]   ;;  %s5920_s9 = inlined_call_operand.hbm [shape: bf16[256,768], index: 9, kind: input, shape index: {}]   ;;  %s5921_s10 = inlined_call_operand.vmem [shape: f32[1,768], index: 10, kind: input, shape index: {}]   ;;  %s5922_s11 = inlined_call_operand.hbm [shape: bf16[768,512], index: 11, kind: input, shape index: {}]   ;;  %s5923_s12 = inlined_call_operand.vmem [shape: f32[1,512], index: 12, kind: input, shape index: {}]   ;;  %s5924_s13 = inlined_call_operand.hbm [shape: bf16[512,512], index: 13, kind: input, shape index: {}]   ;;  %s5925_s14 = inlined_call_operand.vmem [shape: f32[1,512], index: 14, kind: input, shape index: {}]   ;;  %s5926_s15 = inlined_call_operand.vmem [shape: bf16[256,8], index: 15, kind: input, shape index: {}]   ;;  %s5927_s16 = inlined_call_operand.vmem [shape: bf16[8,256], index: 16, kind: input, shape index: {}]   ;;  %s5928_s17 = inlined_call_operand.hbm [shape: f32[8,512], index: 17, kind: output, shape index: {}]  }
   0x1   :  { %5930 = sst [smem:[#allocation15_spill]] %s5911_s0 }
   0x2   :  { %5931 = sst [smem:[#allocation16_spill]] %s5912_s1 }
   0x3   :  { %22 = vsyncpa [#allocation6], 0 }
   0x4   :  { %23 = vsyncpa [#allocation9], 0 }
   0x5   :  { %24 = vsyncpa [#allocation7], 0  ;;  %s5515_s24 = smov [#allocation8]   ;;  %s5421_s28 = scalar_lea.hbm %s5922_s11, 24576 }
   0x6   :  { %s62_s25 = sshll.u32 %s5515_s24, 4  ;;  %p5422_p0 = scmp.ne.s32.totalorder %s5922_s11, %s5421_s28  ;;  %s63_s25 = int_to_ptr.vmem [resolvable:$true] %s62_s25 }
   0x7   :  { %p5425_p1 = scmp.lt.u32.totalorder %s5421_s28, %s5922_s11 }
   0x9   :  { %p5427_p2 = pnand %p5425_p1, %p5422_p0 }
   0xb   :  { %5430 = shalt.err (!%p5427_p2)
}
   0xc   :  { %s5431_s19 = scalar_lea.vmem %s63_s25, 24576  ;;  %p5436_p4 = scmp.lt.s32.totalorder %s63_s25, %s63_s25 }
   0xd   :  { %p5432_p3 = scmp.ne.s32.totalorder %s63_s25, %s5431_s19  ;;  %p5437_p5 = scmp.lt.s32.totalorder %s5431_s19, %s5431_s19 }
   0xf   :  { %p5438_p6 = por %p5437_p5, %p5436_p4 }
  0x11   :  { %p5439_p7 = pnand %p5438_p6, %p5432_p3 }
  0x13   :  { %5442 = shalt.err (!%p5439_p7)
}
  0x14   :  { %s5929_s1 = smov 256   ;;  %s5517_s20 = smov 16  }
  0x15   :  { %68 = dma.hbm_to_vmem [thread:$0]  %s5922_s11, 24576, %s63_s25, [#allocation9], %s5929_s1, %s5929_s1, %s5517_s20  }
  0x16   :  { %s5518_s23 = smov [#allocation5]   ;;  %s5443_s28 = scalar_lea.hbm %s5920_s9, 12288 }
  0x17   :  { %s48_s24 = sshll.u32 %s5518_s23, 4  ;;  %p5444_p8 = scmp.ne.s32.totalorder %s5920_s9, %s5443_s28  ;;  %s49_s24 = int_to_ptr.vmem [resolvable:$true] %s48_s24 }
  0x18   :  { %p5447_p9 = scmp.lt.u32.totalorder %s5443_s28, %s5920_s9 }
  0x1a   :  { %p5449_p10 = pnand %p5447_p9, %p5444_p8 }
  0x1c   :  { %5452 = shalt.err (!%p5449_p10)
}
  0x1d   :  { %s5453_s19 = scalar_lea.vmem %s49_s24, 12288  ;;  %p5458_p12 = scmp.lt.s32.totalorder %s49_s24, %s49_s24 }
  0x1e   :  { %p5454_p11 = scmp.ne.s32.totalorder %s49_s24, %s5453_s19  ;;  %p5459_p13 = scmp.lt.s32.totalorder %s5453_s19, %s5453_s19 }
  0x20   :  { %p5460_p0 = por %p5459_p13, %p5458_p12 }
  0x22   :  { %p5461_p1 = pnand %p5460_p0, %p5454_p11 }
  0x24   :  { %5464 = shalt.err (!%p5461_p1)
}
  0x25   :  { %s5519_s11 = smov 384   ;;  %s5520_s25 = smov 24  }
  0x26   :  { %54 = dma.hbm_to_vmem [thread:$0]  %s5920_s9, 12288, %s49_s24, [#allocation6], %s5519_s11, %s5519_s11, %s5520_s25  }
  0x27   :  { %s5521_s23 = smov [#allocation10]   ;;  %s5465_s29 = scalar_lea.hbm %s5924_s13, 16384 }
  0x28   :  { %s76_s26 = sshll.u32 %s5521_s23, 4  ;;  %p5466_p2 = scmp.ne.s32.totalorder %s5924_s13, %s5465_s29  ;;  %s77_s26 = int_to_ptr.vmem [resolvable:$true] %s76_s26 }
  0x29   :  { %p5469_p3 = scmp.lt.u32.totalorder %s5465_s29, %s5924_s13 }
  0x2b   :  { %p5471_p4 = pnand %p5469_p3, %p5466_p2 }
  0x2d   :  { %5474 = shalt.err (!%p5471_p4)
}
  0x2e   :  { %s5475_s1 = scalar_lea.vmem %s77_s26, 16384  ;;  %p5480_p6 = scmp.lt.s32.totalorder %s77_s26, %s77_s26 }
  0x2f   :  { %p5476_p5 = scmp.ne.s32.totalorder %s77_s26, %s5475_s1  ;;  %p5481_p7 = scmp.lt.s32.totalorder %s5475_s1, %s5475_s1 }
  0x31   :  { %p5482_p8 = por %p5481_p7, %p5480_p6 }
  0x33   :  { %p5483_p9 = pnand %p5482_p8, %p5476_p5 }
  0x35   :  { %5486 = shalt.err (!%p5483_p9)
}
  0x36   :  { %s5932_s9 = smov 256  }
  0x37   :  { %82 = dma.hbm_to_vmem [thread:$0]  %s5924_s13, 16384, %s77_s26, [#allocation9], %s5932_s9, %s5932_s9, %s5517_s20  }
  0x38   :  { %5509 = dma.done.wait [#allocation6], 12288  }
  0x39   :  { %5510 = vsyncadd [#allocation6], 4294955008 }
  0x3a   :  { %5511 = dma.done.wait [#allocation9], 40960  }
  0x3b   :  { %5512 = vsyncadd [#allocation9], 4294926336  ;;  %v5522_v0 = vmov 0   ;;  %v4744_v1 = vld [vmem:[%s5914_s3 + $0x4] ss:$8 sps:$4 sm:$0xff]   ;;  %s5933_s29 = sld [smem:[#allocation15_spill]] }
  0x3c   :  { %173 = vmatprep.mubr.bf16.mxu0 %v5522_v0  ;;  %334 = vmatprep.mubr.bf16.mxu1 %v5522_v0  ;;  %v4746_v2 = vld [vmem:[%s5914_s3] ss:$8 sps:$4 sm:$0xff]   ;;  %v4747_v3 = vld [vmem:[%s5914_s3 + $0x14] ss:$8 sps:$4 sm:$0xff]   ;;  %v4749_v4 = vld [vmem:[%s5914_s3 + $0x10] ss:$8 sps:$4 sm:$0xff]  }
  0x3d   :  { %141 = vmatprep.subr.bf16.mxu0 %v4744_v1  ;;  %v4752_v6 = vld [vmem:[%s5915_s4 + $0x4] ss:$8 sps:$4 sm:$0xff]   ;;  %vm295_vm0 = vcmask 1043456   ;;  %vm137_vm1 = vcmask 261120   ;;  %v4750_v12 = vld [vmem:[%s5915_s4] ss:$8 sps:$4 sm:$0xff]  }
  0x3e   :  { %142 = vmatpush1.bf16.msra.mxu0 %v4746_v2  ;;  %v273_v7 = vld [vmem:[%s5916_s5] sm:$0xff]  ;;  %vm291_vm2 = vcmask 64512   ;;  %v4766_v18 = vld [vmem:[#allocation5 + $0x3c] ss:$24 sps:$4 sm:$0xff]   ;;  %s5934_s4 = sld [smem:[#allocation16_spill]]  ;;  %vm217_vm3 = vcmask 130048  }
  0x3f   :  { %143 = vmatprep.subr.bf16.mxu0 %v4747_v3  ;;  %v4146_v8 = vcombine.high %v273_v7, %v273_v7  ;;  %v4145_v9 = vcombine.low %v273_v7, %v273_v7  ;;  %v271_v10 = vld [vmem:[%s5913_s2] sm:$0xff]  ;;  %v4764_v20 = vld [vmem:[#allocation5 + $0x38] ss:$24 sps:$4 sm:$0xff]   ;;  %v4763_v24 = vld [vmem:[#allocation5 + $0x34] ss:$24 sps:$4 sm:$0xff]   ;;  %s5523_s19 = smov [#allocation11]  }
  0x40   :  { %v4760_v14 = vld [vmem:[#allocation5 + $0xc] ss:$24 sps:$4 sm:$0xff]   ;;  %v272_v15 = vpack.c.bf16 %v271_v10, %v271_v10  ;;  %v4758_v17 = vld [vmem:[#allocation5 + $0x8] ss:$24 sps:$4 sm:$0xff]   ;;  %v4778_v26 = vld [vmem:[#allocation5 + $0x9c] ss:$24 sps:$4 sm:$0xff]  }
  0x41   :  { %v99_v5 = vld [vmem:[%s5933_s29] sm:$0xff]  ;;  %4147 = vmatprep.subr.msk.bf16.mxu1 %vm295_vm0, %v4146_v8  ;;  %v297_v13 = vsel %vm295_vm0, %v4145_v9, 0  ;;  %v4761_v27 = vld [vmem:[#allocation5 + $0x30] ss:$24 sps:$4 sm:$0xff]   ;;  %v4775_v32 = vld [vmem:[#allocation5 + $0x94] ss:$24 sps:$4 sm:$0xff]  }
  0x42   :  { %v100_v11 = vpack.c.bf16 %v99_v5, %v99_v5  ;;  %144 = vmatpush1.bf16.msra.mxu0 %v4749_v4  ;;  %303 = vmatpush1.bf16.msra.mxu1 %v297_v13  ;;  %v4757_v16 = vld [vmem:[#allocation5 + $0x4] ss:$24 sps:$4 sm:$0xff]   ;;  %v4755_v23 = vld [vmem:[#allocation5] ss:$24 sps:$4 sm:$0xff]   ;;  %v4773_v35 = vld [vmem:[#allocation5 + $0x90] ss:$24 sps:$4 sm:$0xff]  }
  0x43   :  { %221 = vmatprep.subr.bf16.mxu0 %v4752_v6  ;;  %1031 = vmatprep.subr.bf16.mxu1 %v4760_v14  ;;  %v4772_v22 = vld [vmem:[#allocation5 + $0x6c] ss:$24 sps:$4 sm:$0xff]   ;;  %v4770_v25 = vld [vmem:[#allocation5 + $0x68] ss:$24 sps:$4 sm:$0xff]   ;;  %v4776_v29 = vld [vmem:[#allocation5 + $0x98] ss:$24 sps:$4 sm:$0xff]  }
  0x44   :  { %v191_v19 = vld [vmem:[%s5934_s4] sm:$0xff]  ;;  %v4790_v34 = vld [vmem:[#allocation5 + $0xfc] ss:$24 sps:$4 sm:$0xff]   ;;  %v4788_v37 = vld [vmem:[#allocation5 + $0xf8] ss:$24 sps:$4 sm:$0xff]   ;;  %s4125_s9 = sshll.u32 %s5523_s19, 4  ;;  %s4126_s9 = int_to_ptr.vmem [resolvable:$true] %s4125_s9 }
  0x45   :  { %4139 = vmatmul.mubr.msk.bf16.vlgmr.msra.gmra.mrb[0].mxu0 %vm137_vm1, %v100_v11  ;;  %4148 = vmatmul.mubr.msk.bf16.vlgmr.msra.gmra.mrb[0].mxu1 %vm291_vm2, %v272_v15  ;;  %v192_v21 = vpack.c.bf16 %v191_v19, %v191_v19  ;;  %v4769_v28 = vld [vmem:[#allocation5 + $0x64] ss:$24 sps:$4 sm:$0xff]   ;;  %v4767_v31 = vld [vmem:[#allocation5 + $0x60] ss:$24 sps:$4 sm:$0xff]   ;;  %v4787_v40 = vld [vmem:[#allocation5 + $0xf4] ss:$24 sps:$4 sm:$0xff]   ;;  %p5492_p11 = scmp.lt.s32.totalorder %s4126_s9, %s4126_s9 }
  0x46   :  { %222 = vmatpush1.bf16.msra.mxu0 %v4750_v12  ;;  %253 = vmatprep.mubr.bf16.mxu0 %v5522_v0  ;;  %v4784_v30 = vld [vmem:[#allocation5 + $0xcc] ss:$24 sps:$4 sm:$0xff]   ;;  %v4782_v33 = vld [vmem:[#allocation5 + $0xc8] ss:$24 sps:$4 sm:$0xff]   ;;  %v4802_v42 = vld [vmem:[#allocation5 + $0x15c] ss:$24 sps:$4 sm:$0xff]  }
  0x47   :  { %980 = vmatprep.subr.bf16.mxu0 %v4757_v16  ;;  %1032 = vmatpush1.bf16.msra.mxu1 %v4758_v17  ;;  %v4781_v36 = vld [vmem:[#allocation5 + $0xc4] ss:$24 sps:$4 sm:$0xff]   ;;  %v4779_v39 = vld [vmem:[#allocation5 + $0xc0] ss:$24 sps:$4 sm:$0xff]   ;;  %v4785_v43 = vld [vmem:[#allocation5 + $0xf0] ss:$24 sps:$4 sm:$0xff]  }
  0x48   :  { %1033 = vmatprep.subr.bf16.mxu1 %v4766_v18  ;;  %v4796_v38 = vld [vmem:[#allocation5 + $0x12c] ss:$24 sps:$4 sm:$0xff]   ;;  %v4794_v41 = vld [vmem:[#allocation5 + $0x128] ss:$24 sps:$4 sm:$0xff]   ;;  %v4800_v45 = vld [vmem:[#allocation5 + $0x158] ss:$24 sps:$4 sm:$0xff]  }
  0x49   :  { %v4793_v44 = vld [vmem:[#allocation5 + $0x124] ss:$24 sps:$4 sm:$0xff]   ;;  %v4791_v46 = vld [vmem:[#allocation5 + $0x120] ss:$24 sps:$4 sm:$0xff]   ;;  %v4799_v48 = vld [vmem:[#allocation5 + $0x154] ss:$24 sps:$4 sm:$0xff]  }
  0x4a   :  { %v4808_v47 = vld [vmem:[#allocation5 + $0x18c] ss:$24 sps:$4 sm:$0xff]   ;;  %v4806_v49 = vld [vmem:[#allocation5 + $0x188] ss:$24 sps:$4 sm:$0xff]   ;;  %v4814_v50 = vld [vmem:[#allocation5 + $0x1bc] ss:$24 sps:$4 sm:$0xff]  }
  0x4b   :  { %1034 = vmatpush1.bf16.msra.mxu1 %v4764_v20  ;;  %v4797_v51 = vld [vmem:[#allocation5 + $0x150] ss:$24 sps:$4 sm:$0xff]   ;;  %v4805_v52 = vld [vmem:[#allocation5 + $0x184] ss:$24 sps:$4 sm:$0xff]   ;;  %v4803_v55 = vld [vmem:[#allocation5 + $0x180] ss:$24 sps:$4 sm:$0xff]   ;;  %v107_v20 = vlaneseq }
  0x4c   :  { %1035 = vmatprep.subr.bf16.mxu1 %v4772_v22  ;;  %v4812_v53 = vld [vmem:[#allocation5 + $0x1b8] ss:$24 sps:$4 sm:$0xff]   ;;  %v4820_v54 = vld [vmem:[#allocation5 + $0x1ec] ss:$24 sps:$4 sm:$0xff]   ;;  %v4818_v57 = vld [vmem:[#allocation5 + $0x1e8] ss:$24 sps:$4 sm:$0xff]  }
  0x4d   :  { %4143 = vmatmul.mubr.msk.bf16.vlgmr.msra.gmra.mrb[4].mxu0 %vm217_vm3, %v192_v21  ;;  %v4811_v56 = vld [vmem:[#allocation5 + $0x1b4] ss:$24 sps:$4 sm:$0xff]   ;;  %v4809_v59 = vld [vmem:[#allocation5 + $0x1b0] ss:$24 sps:$4 sm:$0xff]   ;;  %v4817_v60 = vld [vmem:[#allocation5 + $0x1e4] ss:$24 sps:$4 sm:$0xff]  }
  0x4e   :  { %981 = vmatpush1.bf16.msra.mxu0 %v4755_v23  ;;  %v4826_v58 = vld [vmem:[#allocation5 + $0x21c] ss:$24 sps:$4 sm:$0xff]   ;;  %v4824_v61 = vld [vmem:[#allocation5 + $0x218] ss:$24 sps:$4 sm:$0xff]   ;;  %v4832_v62 = vld [vmem:[#allocation5 + $0x24c] ss:$24 sps:$4 sm:$0xff]  }
  0x4f   :  { %982 = vmatprep.subr.bf16.mxu0 %v4763_v24  ;;  %1036 = vmatpush1.bf16.msra.mxu1 %v4770_v25  ;;  %v4815_v63 = vld [vmem:[#allocation5 + $0x1e0] ss:$24 sps:$4 sm:$0xff]   ;;  %v4823_v1 = vld [vmem:[#allocation5 + $0x214] ss:$24 sps:$4 sm:$0xff]   ;;  %v4821_v3 = vld [vmem:[#allocation5 + $0x210] ss:$24 sps:$4 sm:$0xff]  }
  0x50   :  { %1037 = vmatprep.subr.bf16.mxu1 %v4778_v26  ;;  %v4830_v2 = vld [vmem:[#allocation5 + $0x248] ss:$24 sps:$4 sm:$0xff]   ;;  %v4829_v4 = vld [vmem:[#allocation5 + $0x244] ss:$24 sps:$4 sm:$0xff]   ;;  %v4835_v6 = vld [vmem:[#allocation5 + $0x274] ss:$24 sps:$4 sm:$0xff]  }
  0x51   :  { %v4827_v5 = vld [vmem:[#allocation5 + $0x240] ss:$24 sps:$4 sm:$0xff]   ;;  %v4833_v7 = vld [vmem:[#allocation5 + $0x270] ss:$24 sps:$4 sm:$0xff]   ;;  %v4838_v8 = vld [vmem:[#allocation5 + $0x27c] ss:$24 sps:$4 sm:$0xff]  }
  0x52   :  { %983 = vmatpush1.bf16.msra.mxu0 %v4761_v27  ;;  %v4836_v9 = vld [vmem:[#allocation5 + $0x278] ss:$24 sps:$4 sm:$0xff]   ;;  %v4841_v11 = vld [vmem:[#allocation5 + $0x2a4] ss:$24 sps:$4 sm:$0xff]   ;;  %v4842_v12 = vld [vmem:[#allocation5 + $0x2a8] ss:$24 sps:$4 sm:$0xff]  }
  0x53   :  { %984 = vmatprep.subr.bf16.mxu0 %v4769_v28  ;;  %1038 = vmatpush1.bf16.msra.mxu1 %v4776_v29  ;;  %v4839_v10 = vld [vmem:[#allocation5 + $0x2a0] ss:$24 sps:$4 sm:$0xff]   ;;  %v4844_v13 = vld [vmem:[#allocation5 + $0x2ac] ss:$24 sps:$4 sm:$0xff]   ;;  %v4845_v15 = vld [vmem:[#allocation5 + $0x2d0] ss:$24 sps:$4 sm:$0xff]  }
  0x54   :  { %1039 = vmatprep.subr.bf16.mxu1 %v4784_v30  ;;  %v4847_v14 = vld [vmem:[#allocation5 + $0x2d4] ss:$24 sps:$4 sm:$0xff]   ;;  %v4848_v17 = vld [vmem:[#allocation5 + $0x2d8] ss:$24 sps:$4 sm:$0xff]   ;;  %v4899_v19 = vld [vmem:[%s5926_s15 + $0x40] sm:$0xff]   ;;  %v5695_v21 = vshrl.u32 %v107_v20, 7 }
  0x55   :  { %v4850_v16 = vld [vmem:[#allocation5 + $0x2dc] ss:$24 sps:$4 sm:$0xff]   ;;  %v105_v23 = vld [vmem:[%s5917_s6] sm:$0x3] }
  0x56   :  { %985 = vmatpush1.bf16.msra.mxu0 %v4767_v31  ;;  %v4853_v18 = vld [vmem:[#allocation5 + $0x14] ss:$24 sps:$4 sm:$0xff]   ;;  %v5701_v24 = vsub.s32 0, %v5695_v21  ;;  %v274_v26 = vld [vmem:[%s5919_s8] sm:$0x3]  ;;  %v5707_v27 = vsub.s32 1, %v5695_v21 }
  0x57   :  { %986 = vmatprep.subr.bf16.mxu0 %v4775_v32  ;;  %1040 = vmatpush1.bf16.msra.mxu1 %v4782_v33  ;;  %v195_v29 = vld [vmem:[%s5918_s7] sm:$0x3] }
  0x58   :  { %1041 = vmatprep.subr.bf16.mxu1 %v4790_v34  ;;  %v283_v33 = vrot.slane %v274_v26, %v5707_v27  ;;  %v4878_v20 = vld [vmem:[#allocation5 + $0x1c0] ss:$24 sps:$4 sm:$0xff]  }
  0x5a   :  { %987 = vmatpush1.bf16.msra.mxu0 %v4773_v35  ;;  %v110_v35 = vrot.slane %v105_v23, %v5701_v24 }
  0x5b   :  { %988 = vmatprep.subr.bf16.mxu0 %v4781_v36  ;;  %1042 = vmatpush1.bf16.msra.mxu1 %v4788_v37  ;;  %v200_v36 = vrot.slane %v195_v29, %v5701_v24 }
  0x5c   :  { %1043 = vmatprep.subr.bf16.mxu1 %v4796_v38  ;;  %v114_v38 = vrot.slane %v105_v23, %v5707_v27  ;;  %v4881_v23 = vld [vmem:[#allocation5 + $0x1f0] ss:$24 sps:$4 sm:$0xff]  }
  0x5e   :  { %989 = vmatpush1.bf16.msra.mxu0 %v4779_v39  ;;  %v204_v39 = vrot.slane %v195_v29, %v5707_v27  ;;  %v4887_v29 = vld [vmem:[#allocation5 + $0x250] ss:$24 sps:$4 sm:$0xff]  }
  0x5f   :  { %990 = vmatprep.subr.bf16.mxu0 %v4787_v40  ;;  %1044 = vmatpush1.bf16.msra.mxu1 %v4794_v41 }
  0x60   :  { %1045 = vmatprep.subr.bf16.mxu1 %v4802_v42 }
  0x62   :  { %991 = vmatpush1.bf16.msra.mxu0 %v4785_v43 }
  0x63   :  { %992 = vmatprep.subr.bf16.mxu0 %v4793_v44  ;;  %1046 = vmatpush1.bf16.msra.mxu1 %v4800_v45 }
  0x64   :  { %1047 = vmatprep.subr.bf16.mxu1 %v4808_v47 }
  0x66   :  { %993 = vmatpush1.bf16.msra.mxu0 %v4791_v46 }
  0x67   :  { %994 = vmatprep.subr.bf16.mxu0 %v4799_v48  ;;  %1048 = vmatpush1.bf16.msra.mxu1 %v4806_v49 }
  0x68   :  { %1049 = vmatprep.subr.bf16.mxu1 %v4814_v50  ;;  %v279_v50 = vrot.slane %v274_v26, %v5701_v24  ;;  %v4884_v26 = vld [vmem:[#allocation5 + $0x220] ss:$24 sps:$4 sm:$0xff]  }
  0x6a   :  { %995 = vmatpush1.bf16.msra.mxu0 %v4797_v51 }
  0x6b   :  { %996 = vmatprep.subr.bf16.mxu0 %v4805_v52  ;;  %1050 = vmatpush1.bf16.msra.mxu1 %v4812_v53  ;;  %v4851_v52 = vld [vmem:[#allocation5 + $0x10] ss:$24 sps:$4 sm:$0xff]  }
  0x6c   :  { %1051 = vmatprep.subr.bf16.mxu1 %v4820_v54  ;;  %v4856_v54 = vld [vmem:[#allocation5 + $0x44] ss:$24 sps:$4 sm:$0xff]  }
  0x6e   :  { %997 = vmatpush1.bf16.msra.mxu0 %v4803_v55  ;;  %v4900_v55 = vld [vmem:[%s5926_s15] sm:$0xff]  }
  0x6f   :  { %998 = vmatprep.subr.bf16.mxu0 %v4811_v56  ;;  %1052 = vmatpush1.bf16.msra.mxu1 %v4818_v57  ;;  %v4901_v57 = vld [vmem:[%s5926_s15 + $0x48] sm:$0xff]  }
  0x70   :  { %1053 = vmatprep.subr.bf16.mxu1 %v4826_v58  ;;  %v4854_v58 = vld [vmem:[#allocation5 + $0x40] ss:$24 sps:$4 sm:$0xff]  }
  0x72   :  { %999 = vmatpush1.bf16.msra.mxu0 %v4809_v59  ;;  %v4859_v59 = vld [vmem:[#allocation5 + $0x74] ss:$24 sps:$4 sm:$0xff]  }
  0x73   :  { %1000 = vmatprep.subr.bf16.mxu0 %v4817_v60  ;;  %1054 = vmatpush1.bf16.msra.mxu1 %v4824_v61  ;;  %v4902_v60 = vld [vmem:[%s5926_s15 + $0x8] sm:$0xff]  }
  0x74   :  { %1055 = vmatprep.subr.bf16.mxu1 %v4832_v62  ;;  %v4857_v62 = vld [vmem:[#allocation5 + $0x70] ss:$24 sps:$4 sm:$0xff]  }
  0x76   :  { %1001 = vmatpush1.bf16.msra.mxu0 %v4815_v63  ;;  %v4862_v63 = vld [vmem:[#allocation5 + $0xa4] ss:$24 sps:$4 sm:$0xff]  }
  0x77   :  { %1002 = vmatprep.subr.bf16.mxu0 %v4823_v1  ;;  %1056 = vmatpush1.bf16.msra.mxu1 %v4830_v2  ;;  %v4903_v1 = vld [vmem:[%s5926_s15 + $0x50] sm:$0xff]  }
  0x78   :  { %1057 = vmatprep.subr.bf16.mxu1 %v4838_v8  ;;  %v4904_v2 = vld [vmem:[%s5926_s15 + $0x10] sm:$0xff]  }
  0x79   :  { %v4863_v8 = vld [vmem:[#allocation5 + $0xd0] ss:$24 sps:$4 sm:$0xff]  }
  0x7a   :  { %1003 = vmatpush1.bf16.msra.mxu0 %v4821_v3  ;;  %v4905_v3 = vld [vmem:[%s5926_s15 + $0x58] sm:$0xff]  }
  0x7b   :  { %1004 = vmatprep.subr.bf16.mxu0 %v4829_v4  ;;  %1058 = vmatpush1.bf16.msra.mxu1 %v4836_v9  ;;  %v4860_v4 = vld [vmem:[#allocation5 + $0xa0] ss:$24 sps:$4 sm:$0xff]   ;;  %v4868_v9 = vld [vmem:[#allocation5 + $0x104] ss:$24 sps:$4 sm:$0xff]  }
  0x7c   :  { %1059 = vmatprep.subr.bf16.mxu1 %v4844_v13  ;;  %v4871_v13 = vld [vmem:[#allocation5 + $0x134] ss:$24 sps:$4 sm:$0xff]  }
  0x7e   :  { %1005 = vmatpush1.bf16.msra.mxu0 %v4827_v5  ;;  %v4865_v5 = vld [vmem:[#allocation5 + $0xd4] ss:$24 sps:$4 sm:$0xff]  }
  0x7f   :  { %1006 = vmatprep.subr.bf16.mxu0 %v4835_v6  ;;  %1060 = vmatpush1.bf16.msra.mxu1 %v4842_v12  ;;  %v4906_v6 = vld [vmem:[%s5926_s15 + $0x18] sm:$0xff]  }
  0x80   :  { %1061 = vmatprep.subr.bf16.mxu1 %v4850_v16  ;;  %v4866_v12 = vld [vmem:[#allocation5 + $0x100] ss:$24 sps:$4 sm:$0xff]  }
  0x81   :  { %v4872_v16 = vld [vmem:[#allocation5 + $0x160] ss:$24 sps:$4 sm:$0xff]  }
  0x82   :  { %1007 = vmatpush1.bf16.msra.mxu0 %v4833_v7  ;;  %v4907_v7 = vld [vmem:[%s5926_s15 + $0x60] sm:$0xff]  }
  0x83   :  { %1008 = vmatprep.subr.bf16.mxu0 %v4841_v11  ;;  %1062 = vmatpush1.bf16.msra.mxu1 %v4848_v17  ;;  %v4909_v11 = vld [vmem:[%s5926_s15 + $0x68] sm:$0xff]  }
  0x84   :  { %4657 = vmatprep.subr.bf16.mxu1 %v4899_v19  ;;  %v4877_v17 = vld [vmem:[#allocation5 + $0x194] ss:$24 sps:$4 sm:$0xff]   ;;  %v4880_v19 = vld [vmem:[#allocation5 + $0x1c4] ss:$24 sps:$4 sm:$0xff]  }
  0x86   :  { %1009 = vmatpush1.bf16.msra.mxu0 %v4839_v10  ;;  %v4908_v10 = vld [vmem:[%s5926_s15 + $0x20] sm:$0xff]  }
  0x87   :  { %1010 = vmatprep.subr.bf16.mxu0 %v4847_v14  ;;  %v4869_v14 = vld [vmem:[#allocation5 + $0x130] ss:$24 sps:$4 sm:$0xff]  }
  0x8a   :  { %1011 = vmatpush1.bf16.msra.mxu0 %v4845_v15  ;;  %v4874_v15 = vld [vmem:[#allocation5 + $0x164] ss:$24 sps:$4 sm:$0xff]  }
  0x8b   :  { %1082 = vmatprep.subr.bf16.mxu0 %v4853_v18  ;;  %v4875_v18 = vld [vmem:[#allocation5 + $0x190] ss:$24 sps:$4 sm:$0xff]  }
 0x118   :  { %v175_v22 = vpop.f32.mrb[0].mxu0  ;;  %v336_v30 = vpop.f32.mrb[0].mxu1 }
 0x119   :  { %v177_v25 = vpop.f32.mrb[1].mxu0  ;;  %v338_v32 = vpop.f32.mrb[1].mxu1  ;;  %v176_v42 = vadd.f32 %v175_v22, %v110_v35  ;;  %v337_v56 = vadd.f32 %v336_v30, %v279_v50  ;;  %v4883_v22 = vld [vmem:[#allocation5 + $0x1f4] ss:$24 sps:$4 sm:$0xff]   ;;  %v4892_v30 = vld [vmem:[#allocation5 + $0x284] ss:$24 sps:$4 sm:$0xff]  }
 0x11a   :  { %v179_v28 = vpop.f32.mrb[2].mxu0  ;;  %v340_v34 = vpop.f32.mrb[2].mxu1  ;;  %v339_v41 = vadd.f32 %v338_v32, %v283_v33  ;;  %v178_v45 = vadd.f32 %v177_v25, %v114_v38  ;;  %v4886_v25 = vld [vmem:[#allocation5 + $0x224] ss:$24 sps:$4 sm:$0xff]   ;;  %v4895_v32 = vld [vmem:[#allocation5 + $0x2b4] ss:$24 sps:$4 sm:$0xff]  }
 0x11b   :  { %v180_v31 = vpop.f32.mrb[3].mxu0  ;;  %v341_v37 = vpop.f32.mrb[3].mxu1  ;;  %v5735_v61 = vpack.c.bf16 %v337_v56, %v337_v56  ;;  %v4889_v28 = vld [vmem:[#allocation5 + $0x254] ss:$24 sps:$4 sm:$0xff]   ;;  %v4893_v33 = vld [vmem:[#allocation5 + $0x2b0] ss:$24 sps:$4 sm:$0xff]  }
 0x11c   :  { %v5720_v53 = vpack.c.bf16 %v339_v41, %v339_v41  ;;  %v4890_v31 = vld [vmem:[#allocation5 + $0x280] ss:$24 sps:$4 sm:$0xff]   ;;  %v4898_v34 = vld [vmem:[#allocation5 + $0x2e4] ss:$24 sps:$4 sm:$0xff]   ;;  %v4911_v37 = vld [vmem:[%s5926_s15 + $0x70] sm:$0xff]   ;;  %v5779_v41 = vsub.s32 2, %v5695_v21 }
 0x11d   :  { %v4896_v35 = vld [vmem:[#allocation5 + $0x2e0] ss:$24 sps:$4 sm:$0xff]   ;;  %v4912_v38 = vld [vmem:[%s5926_s15 + $0x30] sm:$0xff]  }
 0x120   :  { %v255_v40 = vpop.f32.mrb[4].mxu0 }
 0x121   :  { %v256_v43 = vadd.f32 %v255_v40, %v200_v36  ;;  %v257_v44 = vpop.f32.mrb[5].mxu0  ;;  %v4910_v36 = vld [vmem:[%s5926_s15 + $0x28] sm:$0xff]   ;;  %v4914_v40 = vld [vmem:[%s5926_s15 + $0x38] sm:$0xff]  }
 0x122   :  { %v258_v46 = vadd.f32 %v257_v44, %v204_v39  ;;  %v259_v47 = vpop.f32.mrb[6].mxu0  ;;  %v4913_v39 = vld [vmem:[%s5926_s15 + $0x78] sm:$0xff]  }
 0x123   :  { %v5717_v48 = vpack.c.bf16 %v256_v43, %v176_v42  ;;  %v260_v49 = vpop.f32.mrb[7].mxu0  ;;  %v5784_v42 = vld [vmem:[%s5921_s10] sm:$0x3f]  ;;  %v5787_v43 = vsub.s32 3, %v5695_v21 }
 0x124   :  { %v4638_v51 = vpack.c.bf16 %v258_v46, %v178_v45  ;;  %v456_v44 = vrot.slane %v5784_v42, %v5701_v24  ;;  %v464_v45 = vrot.slane %v5784_v42, %v5779_v41  ;;  %v460_v46 = vrot.slane %v5784_v42, %v5707_v27 }
 0x125   :  { %v468_v47 = vrot.slane %v5784_v42, %v5787_v43 }
 0x126   :  { %1012 = vmatprep.mubr.bf16.mxu0 %v4638_v51  ;;  %1063 = vmatprep.mubr.bf16.mxu1 %v4638_v51 }
 0x127   :  { %1013 = vmatmul.mubr.bf16.vlgmr.msra.gmra.mrb[8].mxu0 %v5717_v48  ;;  %1064 = vmatmul.mubr.bf16.vlgmr.msra.gmra.mrb[4].mxu1 %v5717_v48 }
 0x128   :  { %1083 = vmatpush1.bf16.msra.mxu0 %v4851_v52  ;;  %1022 = vmatprep.mubr.bf16.mxu0 %v5720_v53 }
 0x129   :  { %1084 = vmatprep.subr.bf16.mxu0 %v4856_v54  ;;  %1073 = vmatprep.mubr.bf16.mxu1 %v5720_v53 }
 0x12a   :  { %4658 = vmatpush3.bf16.msra.mxu1 %v4900_v55 }
 0x12b   :  { %4659 = vmatprep.subr.bf16.mxu1 %v4901_v57 }
 0x12c   :  { %1085 = vmatpush1.bf16.msra.mxu0 %v4854_v58 }
 0x12d   :  { %1086 = vmatprep.subr.bf16.mxu0 %v4859_v59 }
 0x12e   :  { %4660 = vmatpush3.bf16.msra.mxu1 %v4902_v60 }
 0x12f   :  { %1023 = vmatmul.mubr.bf16.gmra.mrb[12].mxu0 %v5735_v61  ;;  %1074 = vmatmul.mubr.bf16.gmra.mrb[8].mxu1 %v5735_v61 }
 0x130   :  { %1087 = vmatpush1.bf16.msra.mxu0 %v4857_v62  ;;  %1114 = vmatprep.mubr.bf16.mxu0 %v4638_v51 }
 0x131   :  { %1088 = vmatprep.subr.bf16.mxu0 %v4862_v63  ;;  %4661 = vmatprep.subr.bf16.mxu1 %v4903_v1 }
 0x132   :  { %4662 = vmatpush3.bf16.msra.mxu1 %v4904_v2 }
 0x133   :  { %4663 = vmatprep.subr.bf16.mxu1 %v4905_v3 }
 0x134   :  { %1089 = vmatpush1.bf16.msra.mxu0 %v4860_v4 }
 0x135   :  { %1090 = vmatprep.subr.bf16.mxu0 %v4865_v5 }
 0x136   :  { %4664 = vmatpush3.bf16.msra.mxu1 %v4906_v6 }
 0x137   :  { %4665 = vmatprep.subr.bf16.mxu1 %v4907_v7 }
 0x138   :  { %1091 = vmatpush1.bf16.msra.mxu0 %v4863_v8 }
 0x139   :  { %1092 = vmatprep.subr.bf16.mxu0 %v4868_v9 }
 0x13a   :  { %4666 = vmatpush3.bf16.msra.mxu1 %v4908_v10 }
 0x13b   :  { %4667 = vmatprep.subr.bf16.mxu1 %v4909_v11 }
 0x13c   :  { %1093 = vmatpush1.bf16.msra.mxu0 %v4866_v12 }
 0x13d   :  { %1094 = vmatprep.subr.bf16.mxu0 %v4871_v13 }
 0x13e   :  { %4668 = vmatpush3.bf16.msra.mxu1 %v4910_v36 }
 0x13f   :  { %4669 = vmatprep.subr.bf16.mxu1 %v4911_v37 }
 0x140   :  { %1095 = vmatpush1.bf16.msra.mxu0 %v4869_v14 }
 0x141   :  { %1096 = vmatprep.subr.bf16.mxu0 %v4874_v15 }
 0x142   :  { %4670 = vmatpush3.bf16.msra.mxu1 %v4912_v38 }
 0x143   :  { %4671 = vmatprep.subr.bf16.mxu1 %v4913_v39 }
 0x144   :  { %1097 = vmatpush1.bf16.msra.mxu0 %v4872_v16 }
 0x145   :  { %1098 = vmatprep.subr.bf16.mxu0 %v4877_v17 }
 0x146   :  { %4672 = vmatpush3.bf16.msra.mxu1 %v4914_v40 }
 0x148   :  { %1099 = vmatpush1.bf16.msra.mxu0 %v4875_v18 }
 0x149   :  { %1100 = vmatprep.subr.bf16.mxu0 %v4880_v19 }
 0x14c   :  { %1101 = vmatpush1.bf16.msra.mxu0 %v4878_v20 }
 0x14d   :  { %1102 = vmatprep.subr.bf16.mxu0 %v4883_v22 }
 0x150   :  { %1103 = vmatpush1.bf16.msra.mxu0 %v4881_v23 }
 0x151   :  { %1104 = vmatprep.subr.bf16.mxu0 %v4886_v25 }
 0x154   :  { %1105 = vmatpush1.bf16.msra.mxu0 %v4884_v26 }
 0x155   :  { %1106 = vmatprep.subr.bf16.mxu0 %v4889_v28 }
 0x158   :  { %1107 = vmatpush1.bf16.msra.mxu0 %v4887_v29 }
 0x159   :  { %1108 = vmatprep.subr.bf16.mxu0 %v4892_v30 }
 0x15c   :  { %1109 = vmatpush1.bf16.msra.mxu0 %v4890_v31 }
 0x15d   :  { %1110 = vmatprep.subr.bf16.mxu0 %v4895_v32 }
 0x160   :  { %1111 = vmatpush1.bf16.msra.mxu0 %v4893_v33 }
 0x161   :  { %1112 = vmatprep.subr.bf16.mxu0 %v4898_v34 }
 0x164   :  { %1113 = vmatpush1.bf16.msra.mxu0 %v4896_v35 }
 0x167   :  { %1115 = vmatmul.mubr.bf16.vlgmr.msra.gmra.mrb[16].mxu0 %v5717_v48 }
 0x168   :  { %1124 = vmatprep.mubr.bf16.mxu0 %v5720_v53 }
 0x16f   :  { %1125 = vmatmul.mubr.bf16.gmra.mrb[20].mxu0 %v5735_v61 }
 0x1fa   :  { %v1014_v48 = vpop.f32.mrb[8].mxu0  ;;  %v1065_v49 = vpop.f32.mrb[4].mxu1 }
 0x1fb   :  { %v1015_v50 = vadd.f32 %v1014_v48, %v456_v44  ;;  %v1066_v51 = vadd.f32 %v1065_v49, %v464_v45  ;;  %v1016_v52 = vpop.f32.mrb[9].mxu0  ;;  %v1067_v53 = vpop.f32.mrb[5].mxu1 }
 0x1fc   :  { %v1017_v54 = vadd.f32 %v1016_v52, %v460_v46  ;;  %v1068_v55 = vadd.f32 %v1067_v53, %v468_v47  ;;  %v1018_v56 = vpop.f32.mrb[10].mxu0  ;;  %v1069_v57 = vpop.f32.mrb[6].mxu1 }
 0x1fd   :  { %v1133_v58 = vmul.f32 %v1066_v51, %v1015_v50  ;;  %v1019_v59 = vadd.f32 %v1018_v56, %v456_v44  ;;  %v1070_v60 = vadd.f32 %v1069_v57, %v464_v45  ;;  %v1020_v61 = vpop.f32.mrb[11].mxu0  ;;  %v1071_v62 = vpop.f32.mrb[7].mxu1 }
 0x1fe   :  { %v1134_v63 = vmul.f32 %v1068_v55, %v1017_v54  ;;  %v1021_v1 = vadd.f32 %v1020_v61, %v460_v46  ;;  %v1072_v2 = vadd.f32 %v1071_v62, %v468_v47  ;;  %v4922_v61 = vld [vmem:[#allocation8 + $0xc] ss:$16 sps:$4 sm:$0xff]   ;;  %v4925_v62 = vld [vmem:[#allocation8 + $0x24] ss:$16 sps:$4 sm:$0xff]  }
 0x1ff   :  { %v1166_v3 = vmul.f32 %v1066_v51, %v1019_v59  ;;  %v1144_v4 = vmul.f32 %v1070_v60, %v1015_v50  ;;  %v1177_v5 = vmul.f32 %v1070_v60, %v1019_v59 }
 0x200   :  { %v1167_v6 = vmul.f32 %v1068_v55, %v1021_v1  ;;  %v1145_v7 = vmul.f32 %v1072_v2, %v1017_v54  ;;  %v1178_v8 = vmul.f32 %v1072_v2, %v1021_v1 }
 0x201   :  { %v4641_v9 = vpack.c.bf16 %v1144_v4, %v1133_v58  ;;  %v4935_v4 = vld [vmem:[#allocation8 + $0x60] ss:$16 sps:$4 sm:$0xff]  }
 0x202   :  { %v1024_v10 = vpop.f32.mrb[12].mxu0  ;;  %v1075_v11 = vpop.f32.mrb[8].mxu1  ;;  %v4642_v12 = vpack.c.bf16 %v1145_v7, %v1134_v63  ;;  %v4923_v63 = vld [vmem:[#allocation8 + $0x20] ss:$16 sps:$4 sm:$0xff]   ;;  %v4949_v7 = vld [vmem:[#allocation8 + $0xa4] ss:$16 sps:$4 sm:$0xff]  }
 0x203   :  { %v1025_v13 = vadd.f32 %v1024_v10, %v456_v44  ;;  %v1076_v14 = vadd.f32 %v1075_v11, %v464_v45  ;;  %v1026_v15 = vpop.f32.mrb[13].mxu0  ;;  %v1077_v16 = vpop.f32.mrb[9].mxu1  ;;  %v4953_v10 = vld [vmem:[#allocation8 + $0xc0] ss:$16 sps:$4 sm:$0xff]   ;;  %v4961_v11 = vld [vmem:[#allocation8 + $0xe4] ss:$16 sps:$4 sm:$0xff]  }
 0x204   :  { %v1027_v17 = vadd.f32 %v1026_v15, %v460_v46  ;;  %v1078_v18 = vadd.f32 %v1077_v16, %v468_v47  ;;  %v1028_v19 = vpop.f32.mrb[14].mxu0  ;;  %v1079_v20 = vpop.f32.mrb[10].mxu1  ;;  %1448 = vmatprep.mubr.bf16.mxu1 %v4642_v12  ;;  %v4959_v12 = vld [vmem:[#allocation8 + $0xe0] ss:$16 sps:$4 sm:$0xff]   ;;  %v4973_v15 = vld [vmem:[#allocation8 + $0x124] ss:$16 sps:$4 sm:$0xff]  }
 0x205   :  { %v1199_v22 = vmul.f32 %v1066_v51, %v1025_v13  ;;  %v1210_v23 = vmul.f32 %v1070_v60, %v1025_v13  ;;  %v1155_v25 = vmul.f32 %v1076_v14, %v1015_v50  ;;  %v1188_v26 = vmul.f32 %v1076_v14, %v1019_v59  ;;  %v1029_v28 = vpop.f32.mrb[15].mxu0  ;;  %v1080_v29 = vpop.f32.mrb[11].mxu1  ;;  %1449 = vmatmul.mubr.bf16.vlgmr.msra.gmra.mrb[12].mxu1 %v4641_v9  ;;  %v4917_v59 = vld [vmem:[#allocation8] ss:$16 sps:$4 sm:$0xff]   ;;  %v4919_v60 = vld [vmem:[#allocation8 + $0x4] ss:$16 sps:$4 sm:$0xff]  }
 0x206   :  { %v1200_v30 = vmul.f32 %v1068_v55, %v1027_v17  ;;  %v1211_v31 = vmul.f32 %v1072_v2, %v1027_v17  ;;  %v1156_v32 = vmul.f32 %v1078_v18, %v1017_v54  ;;  %v1189_v33 = vmul.f32 %v1078_v18, %v1021_v1  ;;  %v1544_v55 = vld [vmem:[%s5927_s16] sm:$0xff]  ;;  %2907 = vmatprep.subr.bf16.mxu0 %v4919_v60 }
 0x207   :  { %v4643_v34 = vpack.c.bf16 %v1166_v3, %v1155_v25  ;;  %v4645_v35 = vpack.c.bf16 %v1188_v26, %v1177_v5  ;;  %v4647_v36 = vpack.c.bf16 %v1210_v23, %v1199_v22  ;;  %v1222_v37 = vmul.f32 %v1078_v18, %v1027_v17  ;;  %2908 = vmatpush1.bf16.msra.mxu0 %v4917_v59  ;;  %v4931_v1 = vld [vmem:[#allocation8 + $0x44] ss:$16 sps:$4 sm:$0xff]   ;;  %v4929_v2 = vld [vmem:[#allocation8 + $0x40] ss:$16 sps:$4 sm:$0xff]  }
 0x208   :  { %v4644_v38 = vpack.c.bf16 %v1167_v6, %v1156_v32  ;;  %v4646_v39 = vpack.c.bf16 %v1189_v33, %v1178_v8  ;;  %v4648_v40 = vpack.c.bf16 %v1211_v31, %v1200_v30  ;;  %v1221_v44 = vmul.f32 %v1076_v14, %v1025_v13  ;;  %2909 = vmatprep.subr.bf16.mxu0 %v4925_v62  ;;  %v4937_v3 = vld [vmem:[#allocation8 + $0x64] ss:$16 sps:$4 sm:$0xff]   ;;  %v4941_v6 = vld [vmem:[#allocation8 + $0x80] ss:$16 sps:$4 sm:$0xff]  }
 0x209   :  { %v4650_v45 = vpack.c.bf16 %v1222_v37, %v1222_v37  ;;  %v4286_v56 = vcombine.high %v1544_v55, %v1544_v55  ;;  %v4285_v57 = vcombine.low %v1544_v55, %v1544_v55  ;;  %v4943_v5 = vld [vmem:[#allocation8 + $0x84] ss:$16 sps:$4 sm:$0xff]   ;;  %v4947_v8 = vld [vmem:[#allocation8 + $0xa0] ss:$16 sps:$4 sm:$0xff]  }
 0x20a   :  { %1456 = vmatprep.mubr.bf16.mxu1 %v4644_v38  ;;  %v4649_v46 = vpack.c.bf16 %v1221_v44, %v1221_v44  ;;  %v4955_v9 = vld [vmem:[#allocation8 + $0xc4] ss:$16 sps:$4 sm:$0xff]   ;;  %v4965_v14 = vld [vmem:[#allocation8 + $0x100] ss:$16 sps:$4 sm:$0xff]  }
 0x20b   :  { %4287 = vmatprep.subr.msk.bf16.mxu1 %vm295_vm0, %v4286_v56  ;;  %v1566_v58 = vsel %vm295_vm0, %v4285_v57, 0  ;;  %2910 = vmatpush1.bf16.msra.mxu0 %v4923_v63  ;;  %v4967_v13 = vld [vmem:[#allocation8 + $0x104] ss:$16 sps:$4 sm:$0xff]   ;;  %v4971_v16 = vld [vmem:[#allocation8 + $0x120] ss:$16 sps:$4 sm:$0xff]  }
 0x20c   :  { %1572 = vmatpush1.bf16.msra.mxu1 %v1566_v58  ;;  %2911 = vmatprep.subr.bf16.mxu0 %v4931_v1  ;;  %v4979_v17 = vld [vmem:[#allocation8 + $0x144] ss:$16 sps:$4 sm:$0xff]   ;;  %v4977_v18 = vld [vmem:[#allocation8 + $0x140] ss:$16 sps:$4 sm:$0xff]  }
 0x20d   :  { %1457 = vmatmul.mubr.bf16.gmra.mrb[16].mxu1 %v4643_v34  ;;  %3030 = vmatprep.subr.bf16.mxu1 %v4922_v61  ;;  %v4985_v19 = vld [vmem:[#allocation8 + $0x164] ss:$16 sps:$4 sm:$0xff]   ;;  %v4983_v20 = vld [vmem:[#allocation8 + $0x160] ss:$16 sps:$4 sm:$0xff]  }
 0x20e   :  { %1464 = vmatprep.mubr.bf16.mxu1 %v4646_v39 }
 0x20f   :  { %2912 = vmatpush1.bf16.msra.mxu0 %v4929_v2 }
 0x210   :  { %2913 = vmatprep.subr.bf16.mxu0 %v4937_v3 }
 0x213   :  { %2914 = vmatpush1.bf16.msra.mxu0 %v4935_v4 }
 0x214   :  { %2915 = vmatprep.subr.bf16.mxu0 %v4943_v5 }
 0x215   :  { %1465 = vmatmul.mubr.bf16.gmra.mrb[20].mxu1 %v4645_v35 }
 0x216   :  { %1472 = vmatprep.mubr.bf16.mxu1 %v4648_v40 }
 0x217   :  { %2916 = vmatpush1.bf16.msra.mxu0 %v4941_v6 }
 0x218   :  { %2917 = vmatprep.subr.bf16.mxu0 %v4949_v7 }
 0x21b   :  { %2918 = vmatpush1.bf16.msra.mxu0 %v4947_v8 }
 0x21c   :  { %2919 = vmatprep.subr.bf16.mxu0 %v4955_v9 }
 0x21d   :  { %1473 = vmatmul.mubr.bf16.gmra.mrb[24].mxu1 %v4647_v36 }
 0x21e   :  { %1480 = vmatprep.mubr.bf16.mxu1 %v4650_v45 }
 0x21f   :  { %2920 = vmatpush1.bf16.msra.mxu0 %v4953_v10 }
 0x220   :  { %2921 = vmatprep.subr.bf16.mxu0 %v4961_v11 }
 0x223   :  { %2922 = vmatpush1.bf16.msra.mxu0 %v4959_v12 }
 0x224   :  { %2923 = vmatprep.subr.bf16.mxu0 %v4967_v13 }
 0x225   :  { %1481 = vmatmul.mubr.bf16.gmra.mrb[28].mxu1 %v4649_v46 }
 0x226   :  { %1603 = vmatprep.mubr.bf16.mxu1 %v5522_v0 }
 0x227   :  { %2924 = vmatpush1.bf16.msra.mxu0 %v4965_v14 }
 0x228   :  { %2925 = vmatprep.subr.bf16.mxu0 %v4973_v15 }
 0x22b   :  { %2926 = vmatpush1.bf16.msra.mxu0 %v4971_v16 }
 0x22c   :  { %2927 = vmatprep.subr.bf16.mxu0 %v4979_v17 }
 0x22f   :  { %2928 = vmatpush1.bf16.msra.mxu0 %v4977_v18 }
 0x230   :  { %2929 = vmatprep.subr.bf16.mxu0 %v4985_v19 }
 0x233   :  { %2930 = vmatpush1.bf16.msra.mxu0 %v4983_v20 }
 0x23a   :  { %v5798_v47 = vpop.f32.mrb[16].mxu0 }
 0x23b   :  { %v5800_v48 = vpop.f32.mrb[17].mxu0 }
 0x23c   :  { %v5802_v49 = vpop.f32.mrb[18].mxu0 }
 0x23d   :  { %v5804_v50 = vpop.f32.mrb[19].mxu0 }
 0x242   :  { %v5806_v51 = vpop.f32.mrb[20].mxu0 }
 0x243   :  { %v5808_v52 = vpop.f32.mrb[21].mxu0 }
 0x244   :  { %v1130_v53 = vpop.f32.mrb[22].mxu0 }
 0x245   :  { %v1131_v54 = vpop.f32.mrb[23].mxu0 }
 0x2d8   :  { %v4673_v22 = vpop.f32.mrb[12].mxu1 }
 0x2d9   :  { %v4674_v23 = vpop.f32.mrb[13].mxu1 }
 0x2da   :  { %v4675_v25 = vadd.f32 %v4674_v23, %v4673_v22  ;;  %v4676_v26 = vpop.f32.mrb[14].mxu1 }
 0x2db   :  { %v4677_v28 = vpop.f32.mrb[15].mxu1 }
 0x2dc   :  { %v4678_v29 = vadd.f32 %v4677_v28, %v4676_v26 }
 0x2de   :  { %v1488_v30 = vmax.f32 %v4675_v25, %v4678_v29 }
 0x2e0   :  { %v4679_v31 = vpop.f32.mrb[16].mxu1 }
 0x2e1   :  { %v4680_v32 = vpop.f32.mrb[17].mxu1 }
 0x2e2   :  { %v4681_v33 = vadd.f32 %v4680_v32, %v4679_v31  ;;  %v4682_v34 = vpop.f32.mrb[18].mxu1 }
 0x2e3   :  { %v4683_v35 = vpop.f32.mrb[19].mxu1 }
 0x2e4   :  { %v1489_v36 = vmax.f32 %v1488_v30, %v4681_v33  ;;  %v4684_v37 = vadd.f32 %v4683_v35, %v4682_v34 }
 0x2e6   :  { %v1494_v38 = vsub.f32 %v4675_v25, %v1489_v36  ;;  %v1495_v39 = vsub.f32 %v4678_v29, %v1489_v36  ;;  %v1496_v40 = vsub.f32 %v4681_v33, %v1489_v36 }
 0x2e8   :  { %v1503_v44 = vmul.f32 1.442695, %v1494_v38  ;;  %v1505_v45 = vmul.f32 1.442695, %v1495_v39  ;;  %v1507_v46 = vmul.f32 1.442695, %v1496_v40 }
 0x2e9   :  { %v4685_v53 = vpop.f32.mrb[20].mxu1  ;;  %v4920_v40 = vld [vmem:[#allocation8 + $0x8] ss:$16 sps:$4 sm:$0xff]  }
 0x2ea   :  { %5397 = vpow2.f32 %v1503_v44  ;;  %v4686_v54 = vpop.f32.mrb[21].mxu1 }
 0x2eb   :  { %5399 = vpow2.f32 %v1505_v45  ;;  %v4687_v55 = vadd.f32 %v4686_v54, %v4685_v53  ;;  %v4688_v56 = vpop.f32.mrb[22].mxu1  ;;  %v4928_v45 = vld [vmem:[#allocation8 + $0x2c] ss:$16 sps:$4 sm:$0xff]  }
 0x2ec   :  { %v4689_v57 = vpop.f32.mrb[23].mxu1  ;;  %5401 = vpow2.f32 %v1507_v46  ;;  %v4926_v46 = vld [vmem:[#allocation8 + $0x28] ss:$16 sps:$4 sm:$0xff]   ;;  %v4934_v53 = vld [vmem:[#allocation8 + $0x4c] ss:$16 sps:$4 sm:$0xff]  }
 0x2ed   :  { %v1490_v58 = vmax.f32 %v4684_v37, %v4687_v55  ;;  %v4690_v59 = vadd.f32 %v4689_v57, %v4688_v56 }
 0x2ef   :  { %v1491_v60 = vmax.f32 %v1490_v58, %v4690_v59  ;;  %v4932_v58 = vld [vmem:[#allocation8 + $0x48] ss:$16 sps:$4 sm:$0xff]  }
 0x2f0   :  { %v4691_v61 = vpop.f32.mrb[24].mxu1 }
 0x2f1   :  { %v1497_v62 = vsub.f32 %v4684_v37, %v1491_v60  ;;  %v1498_v63 = vsub.f32 %v4687_v55, %v1491_v60  ;;  %v1499_v1 = vsub.f32 %v4690_v59, %v1491_v60  ;;  %v4692_v2 = vpop.f32.mrb[25].mxu1  ;;  %v4940_v60 = vld [vmem:[#allocation8 + $0x6c] ss:$16 sps:$4 sm:$0xff]  }
 0x2f2   :  { %v4693_v3 = vadd.f32 %v4692_v2, %v4691_v61  ;;  %v4694_v4 = vpop.f32.mrb[26].mxu1 }
 0x2f3   :  { %v1509_v5 = vmul.f32 1.442695, %v1497_v62  ;;  %v1511_v6 = vmul.f32 1.442695, %v1498_v63  ;;  %v1513_v8 = vmul.f32 1.442695, %v1499_v1 }
 0x2f4   :  { %v5398_v7 = vpop.eup %5397  ;;  %v4695_v9 = vpop.f32.mrb[27].mxu1 }
 0x2f5   :  { %v5400_v10 = vpop.eup %5399  ;;  %5403 = vpow2.f32 %v1509_v5  ;;  %v4696_v11 = vadd.f32 %v4695_v9, %v4694_v4  ;;  %v4938_v4 = vld [vmem:[#allocation8 + $0x68] ss:$16 sps:$4 sm:$0xff]   ;;  %v4946_v5 = vld [vmem:[#allocation8 + $0x8c] ss:$16 sps:$4 sm:$0xff]  }
 0x2f6   :  { %v1521_v12 = vadd.f32 %v5400_v10, %v5398_v7  ;;  %5405 = vpow2.f32 %v1511_v6  ;;  %v5402_v13 = vpop.eup %5401  ;;  %v4944_v6 = vld [vmem:[#allocation8 + $0x88] ss:$16 sps:$4 sm:$0xff]   ;;  %v4958_v9 = vld [vmem:[#allocation8 + $0xcc] ss:$16 sps:$4 sm:$0xff]  }
 0x2f7   :  { %v1492_v14 = vmax.f32 %v4693_v3, %v4696_v11  ;;  %5407 = vpow2.f32 %v1513_v8  ;;  %v4950_v8 = vld [vmem:[#allocation8 + $0xa8] ss:$16 sps:$4 sm:$0xff]  }
 0x2f8   :  { %v1522_v15 = vadd.f32 %v5402_v13, %v1521_v12  ;;  %v4697_v16 = vpop.f32.mrb[28].mxu1 }
 0x2f9   :  { %v4698_v17 = vpop.f32.mrb[29].mxu1 }
 0x2fa   :  { %5409 = vrcp.f32 %v1522_v15  ;;  %v4699_v18 = vadd.f32 %v4698_v17, %v4697_v16  ;;  %v4700_v19 = vpop.f32.mrb[30].mxu1  ;;  %v4964_v16 = vld [vmem:[#allocation8 + $0xec] ss:$16 sps:$4 sm:$0xff]   ;;  %v4962_v17 = vld [vmem:[#allocation8 + $0xe8] ss:$16 sps:$4 sm:$0xff]  }
 0x2fb   :  { %v4701_v20 = vpop.f32.mrb[31].mxu1  ;;  %v4968_v19 = vld [vmem:[#allocation8 + $0x108] ss:$16 sps:$4 sm:$0xff]  }
 0x2fc   :  { %v1493_v22 = vmax.f32 %v1492_v14, %v4699_v18  ;;  %v4956_v14 = vld [vmem:[#allocation8 + $0xc8] ss:$16 sps:$4 sm:$0xff]   ;;  %v4976_v20 = vld [vmem:[#allocation8 + $0x12c] ss:$16 sps:$4 sm:$0xff]  }
 0x2fe   :  { %v1500_v23 = vsub.f32 %v4693_v3, %v1493_v22  ;;  %v1501_v25 = vsub.f32 %v4696_v11, %v1493_v22  ;;  %v1502_v26 = vsub.f32 %v4699_v18, %v1493_v22  ;;  %v4970_v18 = vld [vmem:[#allocation8 + $0x10c] ss:$16 sps:$4 sm:$0xff]  }
 0x2ff   :  { %v5404_v28 = vpop.eup %5403 }
 0x300   :  { %v5406_v29 = vpop.eup %5405  ;;  %v1515_v30 = vmul.f32 1.442695, %v1500_v23  ;;  %v1517_v31 = vmul.f32 1.442695, %v1501_v25  ;;  %v1519_v32 = vmul.f32 1.442695, %v1502_v26 }
 0x301   :  { %v1524_v33 = vadd.f32 %v5406_v29, %v5404_v28  ;;  %v5408_v34 = vpop.eup %5407  ;;  %v4974_v23 = vld [vmem:[#allocation8 + $0x128] ss:$16 sps:$4 sm:$0xff]   ;;  %v4982_v25 = vld [vmem:[#allocation8 + $0x14c] ss:$16 sps:$4 sm:$0xff]  }
 0x302   :  { %5411 = vpow2.f32 %v1515_v30  ;;  %v4980_v26 = vld [vmem:[#allocation8 + $0x148] ss:$16 sps:$4 sm:$0xff]   ;;  %v4994_v30 = vld [vmem:[#allocation8 + $0x18c] ss:$16 sps:$4 sm:$0xff]  }
 0x303   :  { %v1525_v35 = vadd.f32 %v5408_v34, %v1524_v33  ;;  %5413 = vpow2.f32 %v1517_v31  ;;  %v4989_v31 = vld [vmem:[#allocation8 + $0x180] ss:$16 sps:$4 sm:$0xff]  }
 0x304   :  { %v5410_v36 = vpop.eup %5409  ;;  %5415 = vpow2.f32 %v1519_v32  ;;  %v4992_v32 = vld [vmem:[#allocation8 + $0x188] ss:$16 sps:$4 sm:$0xff]   ;;  %v4995_v33 = vld [vmem:[#allocation8 + $0x1a0] ss:$16 sps:$4 sm:$0xff]  }
 0x305   :  { %v1530_v37 = vmul.f32 %v5410_v36, %v5398_v7  ;;  %v1531_v38 = vmul.f32 %v5410_v36, %v5400_v10  ;;  %5417 = vrcp.f32 %v1525_v35  ;;  %v1532_v39 = vmul.f32 %v5410_v36, %v5402_v13  ;;  %v4952_v7 = vld [vmem:[#allocation8 + $0xac] ss:$16 sps:$4 sm:$0xff]   ;;  %v4998_v35 = vld [vmem:[#allocation8 + $0x1a8] ss:$16 sps:$4 sm:$0xff]  }
 0x306   :  { %v5000_v36 = vld [vmem:[#allocation8 + $0x1ac] ss:$16 sps:$4 sm:$0xff]  }
 0x307   :  { %v1539_v44 = vpack.c.bf16 %v1531_v38, %v1530_v37  ;;  %v5003_v37 = vld [vmem:[#allocation8 + $0x1c4] ss:$16 sps:$4 sm:$0xff]   ;;  %v5006_v38 = vld [vmem:[#allocation8 + $0x1cc] ss:$16 sps:$4 sm:$0xff]  }
 0x309   :  { %4288 = vmatmul.mubr.msk.bf16.vlgmr.msra.gmra.mrb[32].mxu1 %vm291_vm2, %v1539_v44  ;;  %v5009_v44 = vld [vmem:[#allocation8 + $0x1e4] ss:$16 sps:$4 sm:$0xff]  }
 0x30a   :  { %1613 = vmatprep.mubr.bf16.mxu1 %v5522_v0  ;;  %3031 = vmatpush1.bf16.msra.mxu1 %v4920_v40  ;;  %v5004_v40 = vld [vmem:[#allocation8 + $0x1c8] ss:$16 sps:$4 sm:$0xff]  }
 0x30b   :  { %3032 = vmatprep.subr.bf16.mxu1 %v4928_v45  ;;  %v5012_v45 = vld [vmem:[#allocation8 + $0x1ec] ss:$16 sps:$4 sm:$0xff]  }
 0x30c   :  { %v5412_v54 = vpop.eup %5411 }
 0x30d   :  { %v5414_v55 = vpop.eup %5413 }
 0x30e   :  { %v5416_v56 = vpop.eup %5415  ;;  %v1527_v57 = vadd.f32 %v5414_v55, %v5412_v54  ;;  %3033 = vmatpush1.bf16.msra.mxu1 %v4926_v46  ;;  %v5007_v46 = vld [vmem:[#allocation8 + $0x1e0] ss:$16 sps:$4 sm:$0xff]  }
 0x30f   :  { %v5418_v59 = vpop.eup %5417  ;;  %3034 = vmatprep.subr.bf16.mxu1 %v4934_v53  ;;  %v5010_v53 = vld [vmem:[#allocation8 + $0x1e8] ss:$16 sps:$4 sm:$0xff]  }
 0x310   :  { %v1528_v61 = vadd.f32 %v5416_v56, %v1527_v57  ;;  %v1533_v62 = vmul.f32 %v5418_v59, %v5404_v28  ;;  %v1534_v63 = vmul.f32 %v5418_v59, %v5406_v29  ;;  %v1535_v1 = vmul.f32 %v5418_v59, %v5408_v34  ;;  %v4988_v28 = vld [vmem:[#allocation8 + $0x16c] ss:$16 sps:$4 sm:$0xff]   ;;  %v4986_v29 = vld [vmem:[#allocation8 + $0x168] ss:$16 sps:$4 sm:$0xff]   ;;  %v4997_v34 = vld [vmem:[#allocation8 + $0x1a4] ss:$16 sps:$4 sm:$0xff]  }
 0x311   :  { %v475_v57 = vsub.s32 5, %v5695_v21 }
 0x312   :  { %5419 = vrcp.f32 %v1528_v61  ;;  %v1540_v2 = vpack.c.bf16 %v1533_v62, %v1532_v39  ;;  %v1541_v3 = vpack.c.bf16 %v1535_v1, %v1534_v63  ;;  %3035 = vmatpush1.bf16.msra.mxu1 %v4932_v58  ;;  %v5001_v39 = vld [vmem:[#allocation8 + $0x1c0] ss:$16 sps:$4 sm:$0xff]  }
 0x313   :  { %3036 = vmatprep.subr.bf16.mxu1 %v4940_v60  ;;  %v476_v59 = vrot.slane %v5784_v42, %v475_v57 }
 0x314   :  { %4289 = vmatmul.mubr.msk.bf16.gmra.mrb[36].mxu1 %vm291_vm2, %v1540_v2 }
 0x315   :  { %1623 = vmatprep.mubr.bf16.mxu1 %v5522_v0  ;;  %v5832_v61 = vadd.f32 %v5800_v48, %v476_v59 }
 0x316   :  { %3037 = vmatpush1.bf16.msra.mxu1 %v4938_v4 }
 0x317   :  { %3038 = vmatprep.subr.bf16.mxu1 %v4946_v5 }
 0x31a   :  { %3039 = vmatpush1.bf16.msra.mxu1 %v4944_v6 }
 0x31b   :  { %3040 = vmatprep.subr.bf16.mxu1 %v4952_v7 }
 0x31c   :  { %v5420_v10 = vpop.eup %5419  ;;  %4290 = vmatmul.mubr.msk.bf16.gmra.mrb[40].mxu1 %vm291_vm2, %v1541_v3  ;;  %v5839_v3 = vadd.f32 %v5804_v50, %v476_v59 }
 0x31d   :  { %1633 = vmatprep.mubr.bf16.mxu1 %v5522_v0  ;;  %v1536_v11 = vmul.f32 %v5420_v10, %v5412_v54  ;;  %v1537_v12 = vmul.f32 %v5420_v10, %v5414_v55  ;;  %v1538_v13 = vmul.f32 %v5420_v10, %v5416_v56  ;;  %v5015_v54 = vld [vmem:[#allocation8 + $0x204] ss:$16 sps:$4 sm:$0xff]   ;;  %v5018_v55 = vld [vmem:[#allocation8 + $0x20c] ss:$16 sps:$4 sm:$0xff]   ;;  %v471_v56 = vsub.s32 4, %v5695_v21 }
 0x31e   :  { %3041 = vmatpush1.bf16.msra.mxu1 %v4950_v8 }
 0x31f   :  { %v1542_v15 = vpack.c.bf16 %v1537_v12, %v1536_v11  ;;  %3042 = vmatprep.subr.bf16.mxu1 %v4958_v9  ;;  %v1543_v22 = vpack.c.bf16 %v1538_v13, %v1538_v13  ;;  %v472_v58 = vrot.slane %v5784_v42, %v471_v56 }
 0x321   :  { %v5829_v60 = vadd.f32 %v5798_v47, %v472_v58  ;;  %v5835_v63 = vadd.f32 %v5802_v49, %v472_v58  ;;  %v5845_v7 = vadd.f32 %v5806_v51, %v472_v58  ;;  %v5848_v49 = vadd.f32 %v5808_v52, %v476_v59  ;;  %v5013_v51 = vld [vmem:[#allocation8 + $0x200] ss:$16 sps:$4 sm:$0xff]   ;;  %v5021_v52 = vld [vmem:[#allocation8 + $0x224] ss:$16 sps:$4 sm:$0xff]   ;;  %v5034_v59 = vld [vmem:[#allocation8 + $0x268] ss:$16 sps:$4 sm:$0xff]  }
 0x322   :  { %3043 = vmatpush1.bf16.msra.mxu1 %v4956_v14  ;;  %v5031_v58 = vld [vmem:[#allocation8 + $0x260] ss:$16 sps:$4 sm:$0xff]  }
 0x323   :  { %3044 = vmatprep.subr.bf16.mxu1 %v4964_v16 }
 0x324   :  { %4291 = vmatmul.mubr.msk.bf16.gmra.mrb[44].mxu1 %vm291_vm2, %v1542_v15 }
 0x325   :  { %1643 = vmatprep.mubr.bf16.mxu1 %v5522_v0  ;;  %v4991_v0 = vld [vmem:[#allocation8 + $0x184] ss:$16 sps:$4 sm:$0xff]  }
 0x326   :  { %3045 = vmatpush1.bf16.msra.mxu1 %v4962_v17  ;;  %2931 = vmatprep.subr.bf16.mxu0 %v4991_v0  ;;  %v5022_v0 = vld [vmem:[#allocation8 + $0x228] ss:$16 sps:$4 sm:$0xff]  }
 0x327   :  { %3046 = vmatprep.subr.bf16.mxu1 %v4970_v18  ;;  %2932 = vmatpush1.bf16.msra.mxu0 %v4989_v31  ;;  %v5016_v18 = vld [vmem:[#allocation8 + $0x208] ss:$16 sps:$4 sm:$0xff]  }
 0x328   :  { %2933 = vmatprep.subr.bf16.mxu0 %v4997_v34  ;;  %v5030_v34 = vld [vmem:[#allocation8 + $0x24c] ss:$16 sps:$4 sm:$0xff]  }
 0x32a   :  { %3047 = vmatpush1.bf16.msra.mxu1 %v4968_v19 }
 0x32b   :  { %3048 = vmatprep.subr.bf16.mxu1 %v4976_v20  ;;  %2934 = vmatpush1.bf16.msra.mxu0 %v4995_v33  ;;  %v5024_v20 = vld [vmem:[#allocation8 + $0x22c] ss:$16 sps:$4 sm:$0xff]   ;;  %v5027_v33 = vld [vmem:[#allocation8 + $0x244] ss:$16 sps:$4 sm:$0xff]  }
 0x32c   :  { %4292 = vmatmul.mubr.msk.bf16.gmra.mrb[48].mxu1 %vm291_vm2, %v1543_v22  ;;  %2935 = vmatprep.subr.bf16.mxu0 %v5003_v37 }
 0x32e   :  { %3049 = vmatpush1.bf16.msra.mxu1 %v4974_v23 }
 0x32f   :  { %3050 = vmatprep.subr.bf16.mxu1 %v4982_v25  ;;  %2936 = vmatpush1.bf16.msra.mxu0 %v5001_v39  ;;  %v5025_v39 = vld [vmem:[#allocation8 + $0x240] ss:$16 sps:$4 sm:$0xff]  }
 0x330   :  { %2937 = vmatprep.subr.bf16.mxu0 %v5009_v44 }
 0x332   :  { %3051 = vmatpush1.bf16.msra.mxu1 %v4980_v26 }
 0x333   :  { %3052 = vmatprep.subr.bf16.mxu1 %v4988_v28  ;;  %2938 = vmatpush1.bf16.msra.mxu0 %v5007_v46  ;;  %v5033_v46 = vld [vmem:[#allocation8 + $0x264] ss:$16 sps:$4 sm:$0xff]  }
 0x334   :  { %2948 = vmatprep.subr.bf16.mxu0 %v5015_v54 }
 0x336   :  { %3053 = vmatpush1.bf16.msra.mxu1 %v4986_v29  ;;  %v5019_v29 = vld [vmem:[#allocation8 + $0x220] ss:$16 sps:$4 sm:$0xff]  }
 0x337   :  { %3054 = vmatprep.subr.bf16.mxu1 %v4994_v30 }
 0x33a   :  { %3055 = vmatpush1.bf16.msra.mxu1 %v4992_v32 }
 0x33b   :  { %3056 = vmatprep.subr.bf16.mxu1 %v5000_v36 }
 0x33e   :  { %3057 = vmatpush1.bf16.msra.mxu1 %v4998_v35 }
 0x33f   :  { %3058 = vmatprep.subr.bf16.mxu1 %v5006_v38 }
 0x342   :  { %3059 = vmatpush1.bf16.msra.mxu1 %v5004_v40  ;;  %v5028_v40 = vld [vmem:[#allocation8 + $0x248] ss:$16 sps:$4 sm:$0xff]  }
 0x343   :  { %3060 = vmatprep.subr.bf16.mxu1 %v5012_v45 }
 0x346   :  { %3061 = vmatpush1.bf16.msra.mxu1 %v5010_v53  ;;  %v5036_v53 = vld [vmem:[#allocation8 + $0x26c] ss:$16 sps:$4 sm:$0xff]  }
 0x347   :  { %3071 = vmatprep.subr.bf16.mxu1 %v5018_v55 }
 0x3dc   :  { %v1605_v62 = vpop.f32.mrb[32].mxu1 }
 0x3dd   :  { %v1652_v1 = vmul.f32 %v1605_v62, %v5829_v60  ;;  %v1607_v2 = vpop.f32.mrb[33].mxu1 }
 0x3de   :  { %v1653_v21 = vmul.f32 %v1607_v2, %v5832_v61  ;;  %v1609_v4 = vpop.f32.mrb[34].mxu1  ;;  %v5039_v2 = vld [vmem:[#allocation8 + $0x284] ss:$16 sps:$4 sm:$0xff]  }
 0x3df   :  { %v1654_v42 = vmul.f32 %v1609_v4, %v5835_v63  ;;  %v1611_v47 = vpop.f32.mrb[35].mxu1 }
 0x3e0   :  { %v1655_v5 = vmul.f32 %v1611_v47, %v5839_v3  ;;  %v5040_v47 = vld [vmem:[#allocation8 + $0x288] ss:$16 sps:$4 sm:$0xff]  }
 0x3e1   :  { %v1656_v48 = vadd.f32 %v1654_v42, %v1652_v1 }
 0x3e2   :  { %v1657_v6 = vadd.f32 %v1655_v5, %v1653_v21  ;;  %v5042_v21 = vld [vmem:[#allocation8 + $0x28c] ss:$16 sps:$4 sm:$0xff]   ;;  %v5045_v5 = vld [vmem:[#allocation8 + $0x2a4] ss:$16 sps:$4 sm:$0xff]  }
 0x3e7   :  { %v1615_v8 = vpop.f32.mrb[36].mxu1 }
 0x3e8   :  { %v1658_v50 = vmul.f32 %v1615_v8, %v5845_v7  ;;  %v1617_v9 = vpop.f32.mrb[37].mxu1 }
 0x3e9   :  { %v1659_v10 = vmul.f32 %v1617_v9, %v5848_v49  ;;  %v1619_v11 = vpop.f32.mrb[38].mxu1  ;;  %v5043_v9 = vld [vmem:[#allocation8 + $0x2a0] ss:$16 sps:$4 sm:$0xff]  }
 0x3ea   :  { %v1660_v12 = vadd.f32 %v1658_v50, %v1656_v48  ;;  %v1671_v13 = vmul.f32 %v1619_v11, %v5829_v60  ;;  %v1621_v14 = vpop.f32.mrb[39].mxu1  ;;  %v5048_v48 = vld [vmem:[#allocation8 + $0x2ac] ss:$16 sps:$4 sm:$0xff]  }
 0x3eb   :  { %v1661_v15 = vadd.f32 %v1659_v10, %v1657_v6  ;;  %v1672_v16 = vmul.f32 %v1621_v14, %v5832_v61  ;;  %v5046_v10 = vld [vmem:[#allocation8 + $0x2a8] ss:$16 sps:$4 sm:$0xff]   ;;  %v5054_v14 = vld [vmem:[#allocation8 + $0x2cc] ss:$16 sps:$4 sm:$0xff]  }
 0x3ec   :  { %v4651_v19 = vpack.c.bf16 %v1660_v12, %v1660_v12 }
 0x3ed   :  { %v4652_v17 = vpack.c.bf16 %v1661_v15, %v1661_v15 }
 0x3ef   :  { %v1625_v22 = vpop.f32.mrb[40].mxu1  ;;  %2939 = vmatprep.mubr.bf16.mxu0 %v4652_v17  ;;  %3062 = vmatprep.mubr.bf16.mxu1 %v4652_v17  ;;  %v5060_v17 = vld [vmem:[#allocation8 + $0x2ec] ss:$16 sps:$4 sm:$0xff]  }
 0x3f0   :  { %v1673_v23 = vmul.f32 %v1625_v22, %v5835_v63  ;;  %v1627_v25 = vpop.f32.mrb[41].mxu1  ;;  %2940 = vmatmul.mubr.bf16.vlgmr.msra.gmra.mrb[24].mxu0 %v4651_v19  ;;  %3063 = vmatmul.mubr.bf16.vlgmr.msra.gmra.mrb[52].mxu1 %v4651_v19  ;;  %v5063_v19 = vld [vmem:[#allocation8 + $0x304] ss:$16 sps:$4 sm:$0xff]   ;;  %v5064_v22 = vld [vmem:[#allocation8 + $0x308] ss:$16 sps:$4 sm:$0xff]  }
 0x3f1   :  { %v1674_v26 = vmul.f32 %v1627_v25, %v5839_v3  ;;  %2949 = vmatpush1.bf16.msra.mxu0 %v5013_v51  ;;  %3072 = vmatpush1.bf16.msra.mxu1 %v5016_v18  ;;  %v1629_v28 = vpop.f32.mrb[42].mxu1  ;;  %v5055_v51 = vld [vmem:[#allocation8 + $0x2e0] ss:$16 sps:$4 sm:$0xff]   ;;  %v5058_v18 = vld [vmem:[#allocation8 + $0x2e8] ss:$16 sps:$4 sm:$0xff]  }
 0x3f2   :  { %v1675_v30 = vadd.f32 %v1673_v23, %v1671_v13  ;;  %v1677_v31 = vmul.f32 %v1629_v28, %v5845_v7  ;;  %v1631_v32 = vpop.f32.mrb[43].mxu1  ;;  %2950 = vmatprep.subr.bf16.mxu0 %v5021_v52  ;;  %3073 = vmatprep.subr.bf16.mxu1 %v5024_v20  ;;  %v5051_v13 = vld [vmem:[#allocation8 + $0x2c4] ss:$16 sps:$4 sm:$0xff]   ;;  %v5066_v52 = vld [vmem:[#allocation8 + $0x30c] ss:$16 sps:$4 sm:$0xff]  }
 0x3f3   :  { %v1676_v35 = vadd.f32 %v1674_v26, %v1672_v16  ;;  %v1678_v36 = vmul.f32 %v1631_v32, %v5848_v49  ;;  %v5052_v16 = vld [vmem:[#allocation8 + $0x2c8] ss:$16 sps:$4 sm:$0xff]   ;;  %v5061_v20 = vld [vmem:[#allocation8 + $0x300] ss:$16 sps:$4 sm:$0xff]   ;;  %v5069_v23 = vld [vmem:[#allocation8 + $0x324] ss:$16 sps:$4 sm:$0xff]  }
 0x3f4   :  { %v5858_v37 = vadd.f32 %v1677_v31, %v1675_v30  ;;  %v5072_v25 = vld [vmem:[#allocation8 + $0x32c] ss:$16 sps:$4 sm:$0xff]   ;;  %v5067_v26 = vld [vmem:[#allocation8 + $0x320] ss:$16 sps:$4 sm:$0xff]   ;;  %v5070_v28 = vld [vmem:[#allocation8 + $0x328] ss:$16 sps:$4 sm:$0xff]  }
 0x3f5   :  { %v1680_v38 = vadd.f32 %v1678_v36, %v1676_v35  ;;  %2951 = vmatpush1.bf16.msra.mxu0 %v5019_v29  ;;  %3074 = vmatpush1.bf16.msra.mxu1 %v5022_v0  ;;  %v5075_v29 = vld [vmem:[#allocation8 + $0x344] ss:$16 sps:$4 sm:$0xff]   ;;  %v5078_v0 = vld [vmem:[#allocation8 + $0x34c] ss:$16 sps:$4 sm:$0xff]   ;;  %v5073_v30 = vld [vmem:[#allocation8 + $0x340] ss:$16 sps:$4 sm:$0xff]  }
 0x3f6   :  { %2952 = vmatprep.subr.bf16.mxu0 %v5027_v33  ;;  %3075 = vmatprep.subr.bf16.mxu1 %v5030_v34  ;;  %v5076_v31 = vld [vmem:[#allocation8 + $0x348] ss:$16 sps:$4 sm:$0xff]   ;;  %v5081_v32 = vld [vmem:[#allocation8 + $0x364] ss:$16 sps:$4 sm:$0xff]   ;;  %v5084_v33 = vld [vmem:[#allocation8 + $0x36c] ss:$16 sps:$4 sm:$0xff]  }
 0x3f7   :  { %v4654_v44 = vpack.c.bf16 %v1680_v38, %v1680_v38  ;;  %v1635_v45 = vpop.f32.mrb[44].mxu1  ;;  %v5079_v34 = vld [vmem:[#allocation8 + $0x360] ss:$16 sps:$4 sm:$0xff]   ;;  %v5082_v35 = vld [vmem:[#allocation8 + $0x368] ss:$16 sps:$4 sm:$0xff]  }
 0x3f8   :  { %v1690_v54 = vmul.f32 %v1635_v45, %v5829_v60  ;;  %v1637_v55 = vpop.f32.mrb[45].mxu1  ;;  %v5087_v36 = vld [vmem:[#allocation8 + $0x384] ss:$16 sps:$4 sm:$0xff]   ;;  %v5090_v38 = vld [vmem:[#allocation8 + $0x38c] ss:$16 sps:$4 sm:$0xff]  }
 0x3f9   :  { %v1691_v56 = vmul.f32 %v1637_v55, %v5832_v61  ;;  %2953 = vmatpush1.bf16.msra.mxu0 %v5025_v39  ;;  %3076 = vmatpush1.bf16.msra.mxu1 %v5028_v40  ;;  %v1639_v57 = vpop.f32.mrb[46].mxu1  ;;  %v5037_v61 = vld [vmem:[#allocation8 + $0x280] ss:$16 sps:$4 sm:$0xff]   ;;  %v5088_v40 = vld [vmem:[#allocation8 + $0x388] ss:$16 sps:$4 sm:$0xff]  }
 0x3fa   :  { %v1692_v62 = vmul.f32 %v1639_v57, %v5835_v63  ;;  %2980 = vmatprep.mubr.bf16.mxu0 %v4654_v44  ;;  %3103 = vmatprep.mubr.bf16.mxu1 %v4654_v44  ;;  %v1641_v1 = vpop.f32.mrb[47].mxu1  ;;  %v5085_v39 = vld [vmem:[#allocation8 + $0x380] ss:$16 sps:$4 sm:$0xff]   ;;  %v5093_v44 = vld [vmem:[#allocation8 + $0x3a4] ss:$16 sps:$4 sm:$0xff]  }
 0x3fb   :  { %v1693_v4 = vmul.f32 %v1641_v1, %v5839_v3  ;;  %2954 = vmatprep.subr.bf16.mxu0 %v5033_v46  ;;  %3077 = vmatprep.subr.bf16.mxu1 %v5036_v53  ;;  %v5096_v45 = vld [vmem:[#allocation8 + $0x3ac] ss:$16 sps:$4 sm:$0xff]   ;;  %v5091_v46 = vld [vmem:[#allocation8 + $0x3a0] ss:$16 sps:$4 sm:$0xff]   ;;  %v5094_v53 = vld [vmem:[#allocation8 + $0x3a8] ss:$16 sps:$4 sm:$0xff]  }
 0x3fc   :  { %v1694_v60 = vadd.f32 %v1692_v62, %v1690_v54  ;;  %v5099_v54 = vld [vmem:[#allocation8 + $0x3c4] ss:$16 sps:$4 sm:$0xff]   ;;  %v5102_v55 = vld [vmem:[#allocation8 + $0x3cc] ss:$16 sps:$4 sm:$0xff]   ;;  %v5100_v57 = vld [vmem:[#allocation8 + $0x3c8] ss:$16 sps:$4 sm:$0xff]  }
 0x3fd   :  { %v1695_v42 = vadd.f32 %v1693_v4, %v1691_v56  ;;  %2955 = vmatpush1.bf16.msra.mxu0 %v5031_v58  ;;  %3078 = vmatpush1.bf16.msra.mxu1 %v5034_v59  ;;  %v5097_v56 = vld [vmem:[#allocation8 + $0x3c0] ss:$16 sps:$4 sm:$0xff]   ;;  %v5105_v58 = vld [vmem:[#allocation8 + $0x3e4] ss:$16 sps:$4 sm:$0xff]   ;;  %v5108_v59 = vld [vmem:[#allocation8 + $0x3ec] ss:$16 sps:$4 sm:$0xff]  }
 0x3fe   :  { %2956 = vmatprep.subr.bf16.mxu0 %v5039_v2  ;;  %3079 = vmatprep.subr.bf16.mxu1 %v5042_v21  ;;  %v5103_v62 = vld [vmem:[#allocation8 + $0x3e0] ss:$16 sps:$4 sm:$0xff]   ;;  %v5106_v1 = vld [vmem:[#allocation8 + $0x3e8] ss:$16 sps:$4 sm:$0xff]   ;;  %v5111_v2 = vld [vmem:[#allocation8 + $0x404] ss:$16 sps:$4 sm:$0xff]  }
 0x3ff   :  { %v1645_v63 = vpop.f32.mrb[48].mxu1  ;;  %v5114_v21 = vld [vmem:[#allocation8 + $0x40c] ss:$16 sps:$4 sm:$0xff]   ;;  %v5109_v4 = vld [vmem:[#allocation8 + $0x400] ss:$16 sps:$4 sm:$0xff]  }
 0x400   :  { %v1696_v6 = vmul.f32 %v1645_v63, %v5845_v7  ;;  %v1647_v8 = vpop.f32.mrb[49].mxu1  ;;  %v5049_v7 = vld [vmem:[#allocation8 + $0x2c0] ss:$16 sps:$4 sm:$0xff]   ;;  %v5118_v63 = vld [vmem:[#allocation8 + $0x428] ss:$16 sps:$4 sm:$0xff]  }
 0x401   :  { %v1697_v50 = vmul.f32 %v1647_v8, %v5848_v49  ;;  %2957 = vmatpush1.bf16.msra.mxu0 %v5037_v61  ;;  %3080 = vmatpush1.bf16.msra.mxu1 %v5040_v47  ;;  %v1649_v3 = vpop.f32.mrb[50].mxu1  ;;  %v5057_v49 = vld [vmem:[#allocation8 + $0x2e4] ss:$16 sps:$4 sm:$0xff]   ;;  %v5121_v8 = vld [vmem:[#allocation8 + $0x440] ss:$16 sps:$4 sm:$0xff]  }
 0x402   :  { %v5866_v11 = vadd.f32 %v1696_v6, %v1694_v60  ;;  %v1650_v12 = vpop.f32.mrb[51].mxu1  ;;  %2958 = vmatprep.subr.bf16.mxu0 %v5045_v5  ;;  %3081 = vmatprep.subr.bf16.mxu1 %v5048_v48  ;;  %v4653_v60 = vpack.c.bf16 %v5858_v37, %v5858_v37  ;;  %v5117_v47 = vld [vmem:[#allocation8 + $0x424] ss:$16 sps:$4 sm:$0xff]   ;;  %v5120_v5 = vld [vmem:[#allocation8 + $0x42c] ss:$16 sps:$4 sm:$0xff]  }
 0x403   :  { %v5868_v15 = vadd.f32 %v1697_v50, %v1695_v42  ;;  %v5112_v42 = vld [vmem:[#allocation8 + $0x408] ss:$16 sps:$4 sm:$0xff]   ;;  %v5115_v48 = vld [vmem:[#allocation8 + $0x420] ss:$16 sps:$4 sm:$0xff]   ;;  %v5123_v6 = vld [vmem:[#allocation8 + $0x444] ss:$16 sps:$4 sm:$0xff]  }
 0x404   :  { %v5126_v37 = vld [vmem:[#allocation8 + $0x44c] ss:$16 sps:$4 sm:$0xff]   ;;  %v5124_v50 = vld [vmem:[#allocation8 + $0x448] ss:$16 sps:$4 sm:$0xff]   ;;  %v5129_v3 = vld [vmem:[#allocation8 + $0x464] ss:$16 sps:$4 sm:$0xff]  }
 0x405   :  { %2959 = vmatpush1.bf16.msra.mxu0 %v5043_v9  ;;  %3082 = vmatpush1.bf16.msra.mxu1 %v5046_v10  ;;  %v4656_v61 = vpack.c.bf16 %v5868_v15, %v5868_v15  ;;  %v5132_v9 = vld [vmem:[#allocation8 + $0x46c] ss:$16 sps:$4 sm:$0xff]   ;;  %v5127_v10 = vld [vmem:[#allocation8 + $0x460] ss:$16 sps:$4 sm:$0xff]   ;;  %v5130_v12 = vld [vmem:[#allocation8 + $0x468] ss:$16 sps:$4 sm:$0xff]  }
 0x406   :  { %2960 = vmatprep.subr.bf16.mxu0 %v5051_v13  ;;  %3083 = vmatprep.subr.bf16.mxu1 %v5054_v14  ;;  %v5135_v13 = vld [vmem:[#allocation8 + $0x484] ss:$16 sps:$4 sm:$0xff]   ;;  %v5138_v14 = vld [vmem:[#allocation8 + $0x48c] ss:$16 sps:$4 sm:$0xff]   ;;  %v5133_v15 = vld [vmem:[#allocation8 + $0x480] ss:$16 sps:$4 sm:$0xff]  }
 0x409   :  { %2961 = vmatpush1.bf16.msra.mxu0 %v5049_v7  ;;  %3084 = vmatpush1.bf16.msra.mxu1 %v5052_v16  ;;  %v5136_v7 = vld [vmem:[#allocation8 + $0x488] ss:$16 sps:$4 sm:$0xff]   ;;  %v5141_v16 = vld [vmem:[#allocation8 + $0x4a4] ss:$16 sps:$4 sm:$0xff]  }
 0x40a   :  { %2962 = vmatprep.subr.bf16.mxu0 %v5057_v49  ;;  %3085 = vmatprep.subr.bf16.mxu1 %v5060_v17  ;;  %v5144_v49 = vld [vmem:[#allocation8 + $0x4ac] ss:$16 sps:$4 sm:$0xff]   ;;  %v5139_v17 = vld [vmem:[#allocation8 + $0x4a0] ss:$16 sps:$4 sm:$0xff]  }
 0x40d   :  { %2963 = vmatpush1.bf16.msra.mxu0 %v5055_v51  ;;  %3086 = vmatpush1.bf16.msra.mxu1 %v5058_v18  ;;  %v5142_v51 = vld [vmem:[#allocation8 + $0x4a8] ss:$16 sps:$4 sm:$0xff]   ;;  %v5147_v18 = vld [vmem:[#allocation8 + $0x4c4] ss:$16 sps:$4 sm:$0xff]  }
 0x40e   :  { %2964 = vmatprep.subr.bf16.mxu0 %v5063_v19  ;;  %3087 = vmatprep.subr.bf16.mxu1 %v5066_v52  ;;  %v5150_v19 = vld [vmem:[#allocation8 + $0x4cc] ss:$16 sps:$4 sm:$0xff]   ;;  %v5145_v52 = vld [vmem:[#allocation8 + $0x4c0] ss:$16 sps:$4 sm:$0xff]  }
 0x411   :  { %2965 = vmatpush1.bf16.msra.mxu0 %v5061_v20  ;;  %3088 = vmatpush1.bf16.msra.mxu1 %v5064_v22  ;;  %v5148_v20 = vld [vmem:[#allocation8 + $0x4c8] ss:$16 sps:$4 sm:$0xff]   ;;  %v5153_v22 = vld [vmem:[#allocation8 + $0x4e4] ss:$16 sps:$4 sm:$0xff]  }
 0x412   :  { %2966 = vmatprep.subr.bf16.mxu0 %v5069_v23  ;;  %3089 = vmatprep.subr.bf16.mxu1 %v5072_v25  ;;  %v5156_v23 = vld [vmem:[#allocation8 + $0x4ec] ss:$16 sps:$4 sm:$0xff]   ;;  %v5151_v25 = vld [vmem:[#allocation8 + $0x4e0] ss:$16 sps:$4 sm:$0xff]  }
 0x415   :  { %2967 = vmatpush1.bf16.msra.mxu0 %v5067_v26  ;;  %3090 = vmatpush1.bf16.msra.mxu1 %v5070_v28  ;;  %v5154_v26 = vld [vmem:[#allocation8 + $0x4e8] ss:$16 sps:$4 sm:$0xff]   ;;  %v5159_v28 = vld [vmem:[#allocation8 + $0x504] ss:$16 sps:$4 sm:$0xff]  }
 0x416   :  { %2968 = vmatprep.subr.bf16.mxu0 %v5075_v29  ;;  %3091 = vmatprep.subr.bf16.mxu1 %v5078_v0  ;;  %v5162_v29 = vld [vmem:[#allocation8 + $0x50c] ss:$16 sps:$4 sm:$0xff]   ;;  %v5157_v0 = vld [vmem:[#allocation8 + $0x500] ss:$16 sps:$4 sm:$0xff]  }
 0x419   :  { %2969 = vmatpush1.bf16.msra.mxu0 %v5073_v30  ;;  %3092 = vmatpush1.bf16.msra.mxu1 %v5076_v31  ;;  %v5160_v30 = vld [vmem:[#allocation8 + $0x508] ss:$16 sps:$4 sm:$0xff]   ;;  %v5165_v31 = vld [vmem:[#allocation8 + $0x524] ss:$16 sps:$4 sm:$0xff]  }
 0x41a   :  { %2970 = vmatprep.subr.bf16.mxu0 %v5081_v32  ;;  %3093 = vmatprep.subr.bf16.mxu1 %v5084_v33  ;;  %v5168_v32 = vld [vmem:[#allocation8 + $0x52c] ss:$16 sps:$4 sm:$0xff]   ;;  %v5163_v33 = vld [vmem:[#allocation8 + $0x520] ss:$16 sps:$4 sm:$0xff]  }
 0x41d   :  { %2971 = vmatpush1.bf16.msra.mxu0 %v5079_v34  ;;  %3094 = vmatpush1.bf16.msra.mxu1 %v5082_v35  ;;  %v5166_v34 = vld [vmem:[#allocation8 + $0x528] ss:$16 sps:$4 sm:$0xff]   ;;  %v5171_v35 = vld [vmem:[#allocation8 + $0x544] ss:$16 sps:$4 sm:$0xff]  }
 0x41e   :  { %2972 = vmatprep.subr.bf16.mxu0 %v5087_v36  ;;  %3095 = vmatprep.subr.bf16.mxu1 %v5090_v38  ;;  %v5174_v36 = vld [vmem:[#allocation8 + $0x54c] ss:$16 sps:$4 sm:$0xff]   ;;  %v5169_v38 = vld [vmem:[#allocation8 + $0x540] ss:$16 sps:$4 sm:$0xff]  }
 0x421   :  { %2973 = vmatpush1.bf16.msra.mxu0 %v5085_v39  ;;  %3096 = vmatpush1.bf16.msra.mxu1 %v5088_v40  ;;  %v5172_v39 = vld [vmem:[#allocation8 + $0x548] ss:$16 sps:$4 sm:$0xff]   ;;  %v5177_v40 = vld [vmem:[#allocation8 + $0x564] ss:$16 sps:$4 sm:$0xff]  }
 0x422   :  { %2974 = vmatprep.subr.bf16.mxu0 %v5093_v44  ;;  %3097 = vmatprep.subr.bf16.mxu1 %v5096_v45  ;;  %v5180_v44 = vld [vmem:[#allocation8 + $0x56c] ss:$16 sps:$4 sm:$0xff]   ;;  %v5175_v45 = vld [vmem:[#allocation8 + $0x560] ss:$16 sps:$4 sm:$0xff]  }
 0x425   :  { %2975 = vmatpush1.bf16.msra.mxu0 %v5091_v46  ;;  %3098 = vmatpush1.bf16.msra.mxu1 %v5094_v53  ;;  %v5178_v46 = vld [vmem:[#allocation8 + $0x568] ss:$16 sps:$4 sm:$0xff]   ;;  %v5183_v53 = vld [vmem:[#allocation8 + $0x584] ss:$16 sps:$4 sm:$0xff]  }
 0x426   :  { %2976 = vmatprep.subr.bf16.mxu0 %v5099_v54  ;;  %3099 = vmatprep.subr.bf16.mxu1 %v5102_v55  ;;  %v5186_v54 = vld [vmem:[#allocation8 + $0x58c] ss:$16 sps:$4 sm:$0xff]   ;;  %v5181_v55 = vld [vmem:[#allocation8 + $0x580] ss:$16 sps:$4 sm:$0xff]  }
 0x429   :  { %2977 = vmatpush1.bf16.msra.mxu0 %v5097_v56  ;;  %3100 = vmatpush1.bf16.msra.mxu1 %v5100_v57  ;;  %v5184_v56 = vld [vmem:[#allocation8 + $0x588] ss:$16 sps:$4 sm:$0xff]   ;;  %v5189_v57 = vld [vmem:[#allocation8 + $0x5a4] ss:$16 sps:$4 sm:$0xff]  }
 0x42a   :  { %2978 = vmatprep.subr.bf16.mxu0 %v5105_v58  ;;  %3101 = vmatprep.subr.bf16.mxu1 %v5108_v59  ;;  %v5192_v58 = vld [vmem:[#allocation8 + $0x5ac] ss:$16 sps:$4 sm:$0xff]   ;;  %v5187_v59 = vld [vmem:[#allocation8 + $0x5a0] ss:$16 sps:$4 sm:$0xff]  }
 0x42d   :  { %2979 = vmatpush1.bf16.msra.mxu0 %v5103_v62  ;;  %3102 = vmatpush1.bf16.msra.mxu1 %v5106_v1  ;;  %v5190_v62 = vld [vmem:[#allocation8 + $0x5a8] ss:$16 sps:$4 sm:$0xff]   ;;  %v5195_v1 = vld [vmem:[#allocation8 + $0x5c4] ss:$16 sps:$4 sm:$0xff]  }
 0x42e   :  { %2989 = vmatprep.subr.bf16.mxu0 %v5111_v2  ;;  %3112 = vmatprep.subr.bf16.mxu1 %v5114_v21  ;;  %v5198_v2 = vld [vmem:[#allocation8 + $0x5cc] ss:$16 sps:$4 sm:$0xff]   ;;  %v5193_v21 = vld [vmem:[#allocation8 + $0x5c0] ss:$16 sps:$4 sm:$0xff]  }
 0x430   :  { %2981 = vmatmul.mubr.bf16.vlgmr.msra.gmra.mrb[24].mxu0 %v4653_v60  ;;  %3104 = vmatmul.mubr.bf16.vlgmr.msra.gmra.mrb[52].mxu1 %v4653_v60  ;;  %v5201_v60 = vld [vmem:[#allocation8 + $0x5e4] ss:$16 sps:$4 sm:$0xff]  }
 0x431   :  { %2990 = vmatpush1.bf16.msra.mxu0 %v5109_v4  ;;  %3021 = vmatprep.mubr.bf16.mxu0 %v4656_v61  ;;  %v5196_v4 = vld [vmem:[#allocation8 + $0x5c8] ss:$16 sps:$4 sm:$0xff]  }
 0x432   :  { %3113 = vmatpush1.bf16.msra.mxu1 %v5112_v42  ;;  %3144 = vmatprep.mubr.bf16.mxu1 %v4656_v61  ;;  %v5204_v42 = vld [vmem:[#allocation8 + $0x5ec] ss:$16 sps:$4 sm:$0xff]   ;;  %v5199_v61 = vld [vmem:[#allocation8 + $0x5e0] ss:$16 sps:$4 sm:$0xff]  }
 0x433   :  { %2991 = vmatprep.subr.bf16.mxu0 %v5117_v47  ;;  %3114 = vmatprep.subr.bf16.mxu1 %v5120_v5  ;;  %v5202_v47 = vld [vmem:[#allocation8 + $0x5e8] ss:$16 sps:$4 sm:$0xff]   ;;  %v5207_v5 = vld [vmem:[#allocation10 + $0x4] ss:$16 sps:$4 sm:$0xff]  }
 0x435   :  { %2992 = vmatpush1.bf16.msra.mxu0 %v5115_v48  ;;  %v5210_v48 = vld [vmem:[#allocation10 + $0xc] ss:$16 sps:$4 sm:$0xff]  }
 0x436   :  { %3115 = vmatpush1.bf16.msra.mxu1 %v5118_v63  ;;  %2993 = vmatprep.subr.bf16.mxu0 %v5123_v6  ;;  %v5205_v63 = vld [vmem:[#allocation10] ss:$16 sps:$4 sm:$0xff]   ;;  %v4655_v6 = vpack.c.bf16 %v5866_v11, %v5866_v11  ;;  %v5220_v11 = vld [vmem:[#allocation10 + $0x48] ss:$16 sps:$4 sm:$0xff]  }
 0x437   :  { %3116 = vmatprep.subr.bf16.mxu1 %v5126_v37  ;;  %v5208_v37 = vld [vmem:[#allocation10 + $0x8] ss:$16 sps:$4 sm:$0xff]  }
 0x439   :  { %2994 = vmatpush1.bf16.msra.mxu0 %v5121_v8  ;;  %v5213_v8 = vld [vmem:[#allocation10 + $0x24] ss:$16 sps:$4 sm:$0xff]  }
 0x43a   :  { %3117 = vmatpush1.bf16.msra.mxu1 %v5124_v50  ;;  %2995 = vmatprep.subr.bf16.mxu0 %v5129_v3  ;;  %v5216_v50 = vld [vmem:[#allocation10 + $0x2c] ss:$16 sps:$4 sm:$0xff]   ;;  %v5211_v3 = vld [vmem:[#allocation10 + $0x20] ss:$16 sps:$4 sm:$0xff]  }
 0x43b   :  { %3118 = vmatprep.subr.bf16.mxu1 %v5132_v9  ;;  %v5214_v9 = vld [vmem:[#allocation10 + $0x28] ss:$16 sps:$4 sm:$0xff]  }
 0x43d   :  { %2996 = vmatpush1.bf16.msra.mxu0 %v5127_v10  ;;  %v5219_v10 = vld [vmem:[#allocation10 + $0x44] ss:$16 sps:$4 sm:$0xff]  }
 0x43e   :  { %3119 = vmatpush1.bf16.msra.mxu1 %v5130_v12  ;;  %2997 = vmatprep.subr.bf16.mxu0 %v5135_v13  ;;  %v5222_v12 = vld [vmem:[#allocation10 + $0x4c] ss:$16 sps:$4 sm:$0xff]   ;;  %v5217_v13 = vld [vmem:[#allocation10 + $0x40] ss:$16 sps:$4 sm:$0xff]  }
 0x43f   :  { %3120 = vmatprep.subr.bf16.mxu1 %v5138_v14  ;;  %v5225_v14 = vld [vmem:[#allocation10 + $0x64] ss:$16 sps:$4 sm:$0xff]  }
 0x441   :  { %2998 = vmatpush1.bf16.msra.mxu0 %v5133_v15  ;;  %v5228_v15 = vld [vmem:[#allocation10 + $0x6c] ss:$16 sps:$4 sm:$0xff]  }
 0x442   :  { %3121 = vmatpush1.bf16.msra.mxu1 %v5136_v7  ;;  %2999 = vmatprep.subr.bf16.mxu0 %v5141_v16  ;;  %v5223_v7 = vld [vmem:[#allocation10 + $0x60] ss:$16 sps:$4 sm:$0xff]   ;;  %v5226_v16 = vld [vmem:[#allocation10 + $0x68] ss:$16 sps:$4 sm:$0xff]  }
 0x443   :  { %3122 = vmatprep.subr.bf16.mxu1 %v5144_v49  ;;  %v5231_v49 = vld [vmem:[#allocation10 + $0x84] ss:$16 sps:$4 sm:$0xff]  }
 0x445   :  { %3000 = vmatpush1.bf16.msra.mxu0 %v5139_v17  ;;  %v5234_v17 = vld [vmem:[#allocation10 + $0x8c] ss:$16 sps:$4 sm:$0xff]  }
 0x446   :  { %3123 = vmatpush1.bf16.msra.mxu1 %v5142_v51  ;;  %3001 = vmatprep.subr.bf16.mxu0 %v5147_v18  ;;  %v5229_v51 = vld [vmem:[#allocation10 + $0x80] ss:$16 sps:$4 sm:$0xff]   ;;  %v5232_v18 = vld [vmem:[#allocation10 + $0x88] ss:$16 sps:$4 sm:$0xff]  }
 0x447   :  { %3124 = vmatprep.subr.bf16.mxu1 %v5150_v19  ;;  %v5237_v19 = vld [vmem:[#allocation10 + $0xa4] ss:$16 sps:$4 sm:$0xff]  }
 0x449   :  { %3002 = vmatpush1.bf16.msra.mxu0 %v5145_v52  ;;  %v5240_v52 = vld [vmem:[#allocation10 + $0xac] ss:$16 sps:$4 sm:$0xff]  }
 0x44a   :  { %3125 = vmatpush1.bf16.msra.mxu1 %v5148_v20  ;;  %3003 = vmatprep.subr.bf16.mxu0 %v5153_v22  ;;  %v5235_v20 = vld [vmem:[#allocation10 + $0xa0] ss:$16 sps:$4 sm:$0xff]   ;;  %v5238_v22 = vld [vmem:[#allocation10 + $0xa8] ss:$16 sps:$4 sm:$0xff]  }
 0x44b   :  { %3126 = vmatprep.subr.bf16.mxu1 %v5156_v23  ;;  %v5243_v23 = vld [vmem:[#allocation10 + $0xc4] ss:$16 sps:$4 sm:$0xff]  }
 0x44d   :  { %3004 = vmatpush1.bf16.msra.mxu0 %v5151_v25  ;;  %v5246_v25 = vld [vmem:[#allocation10 + $0xcc] ss:$16 sps:$4 sm:$0xff]  }
 0x44e   :  { %3127 = vmatpush1.bf16.msra.mxu1 %v5154_v26  ;;  %3005 = vmatprep.subr.bf16.mxu0 %v5159_v28  ;;  %v5241_v26 = vld [vmem:[#allocation10 + $0xc0] ss:$16 sps:$4 sm:$0xff]   ;;  %v5244_v28 = vld [vmem:[#allocation10 + $0xc8] ss:$16 sps:$4 sm:$0xff]  }
 0x44f   :  { %3128 = vmatprep.subr.bf16.mxu1 %v5162_v29  ;;  %v5249_v29 = vld [vmem:[#allocation10 + $0xe4] ss:$16 sps:$4 sm:$0xff]  }
 0x451   :  { %3006 = vmatpush1.bf16.msra.mxu0 %v5157_v0  ;;  %v5252_v0 = vld [vmem:[#allocation10 + $0xec] ss:$16 sps:$4 sm:$0xff]  }
 0x452   :  { %3129 = vmatpush1.bf16.msra.mxu1 %v5160_v30  ;;  %3007 = vmatprep.subr.bf16.mxu0 %v5165_v31  ;;  %v5247_v30 = vld [vmem:[#allocation10 + $0xe0] ss:$16 sps:$4 sm:$0xff]   ;;  %v5250_v31 = vld [vmem:[#allocation10 + $0xe8] ss:$16 sps:$4 sm:$0xff]  }
 0x453   :  { %3130 = vmatprep.subr.bf16.mxu1 %v5168_v32  ;;  %v5255_v32 = vld [vmem:[#allocation10 + $0x104] ss:$16 sps:$4 sm:$0xff]  }
 0x455   :  { %3008 = vmatpush1.bf16.msra.mxu0 %v5163_v33  ;;  %v5258_v33 = vld [vmem:[#allocation10 + $0x10c] ss:$16 sps:$4 sm:$0xff]  }
 0x456   :  { %3131 = vmatpush1.bf16.msra.mxu1 %v5166_v34  ;;  %3009 = vmatprep.subr.bf16.mxu0 %v5171_v35  ;;  %v5253_v34 = vld [vmem:[#allocation10 + $0x100] ss:$16 sps:$4 sm:$0xff]   ;;  %v5256_v35 = vld [vmem:[#allocation10 + $0x108] ss:$16 sps:$4 sm:$0xff]  }
 0x457   :  { %3132 = vmatprep.subr.bf16.mxu1 %v5174_v36  ;;  %v5261_v36 = vld [vmem:[#allocation10 + $0x124] ss:$16 sps:$4 sm:$0xff]  }
 0x459   :  { %3010 = vmatpush1.bf16.msra.mxu0 %v5169_v38  ;;  %v5264_v38 = vld [vmem:[#allocation10 + $0x12c] ss:$16 sps:$4 sm:$0xff]  }
 0x45a   :  { %3133 = vmatpush1.bf16.msra.mxu1 %v5172_v39  ;;  %3011 = vmatprep.subr.bf16.mxu0 %v5177_v40  ;;  %v5259_v39 = vld [vmem:[#allocation10 + $0x120] ss:$16 sps:$4 sm:$0xff]   ;;  %v5262_v40 = vld [vmem:[#allocation10 + $0x128] ss:$16 sps:$4 sm:$0xff]  }
 0x45b   :  { %3134 = vmatprep.subr.bf16.mxu1 %v5180_v44  ;;  %v5267_v44 = vld [vmem:[#allocation10 + $0x144] ss:$16 sps:$4 sm:$0xff]  }
 0x45d   :  { %3012 = vmatpush1.bf16.msra.mxu0 %v5175_v45  ;;  %v5270_v45 = vld [vmem:[#allocation10 + $0x14c] ss:$16 sps:$4 sm:$0xff]  }
 0x45e   :  { %3135 = vmatpush1.bf16.msra.mxu1 %v5178_v46  ;;  %3013 = vmatprep.subr.bf16.mxu0 %v5183_v53  ;;  %v5265_v46 = vld [vmem:[#allocation10 + $0x140] ss:$16 sps:$4 sm:$0xff]   ;;  %v5268_v53 = vld [vmem:[#allocation10 + $0x148] ss:$16 sps:$4 sm:$0xff]  }
 0x45f   :  { %3136 = vmatprep.subr.bf16.mxu1 %v5186_v54  ;;  %v5273_v54 = vld [vmem:[#allocation10 + $0x164] ss:$16 sps:$4 sm:$0xff]  }
 0x461   :  { %3014 = vmatpush1.bf16.msra.mxu0 %v5181_v55  ;;  %v5276_v55 = vld [vmem:[#allocation10 + $0x16c] ss:$16 sps:$4 sm:$0xff]  }
 0x462   :  { %3137 = vmatpush1.bf16.msra.mxu1 %v5184_v56  ;;  %3015 = vmatprep.subr.bf16.mxu0 %v5189_v57  ;;  %v5271_v56 = vld [vmem:[#allocation10 + $0x160] ss:$16 sps:$4 sm:$0xff]   ;;  %v5274_v57 = vld [vmem:[#allocation10 + $0x168] ss:$16 sps:$4 sm:$0xff]  }
 0x463   :  { %3138 = vmatprep.subr.bf16.mxu1 %v5192_v58  ;;  %v5279_v58 = vld [vmem:[#allocation10 + $0x184] ss:$16 sps:$4 sm:$0xff]  }
 0x465   :  { %3016 = vmatpush1.bf16.msra.mxu0 %v5187_v59  ;;  %v5282_v59 = vld [vmem:[#allocation10 + $0x18c] ss:$16 sps:$4 sm:$0xff]  }
 0x466   :  { %3139 = vmatpush1.bf16.msra.mxu1 %v5190_v62  ;;  %3017 = vmatprep.subr.bf16.mxu0 %v5195_v1  ;;  %v5277_v62 = vld [vmem:[#allocation10 + $0x180] ss:$16 sps:$4 sm:$0xff]   ;;  %v5280_v1 = vld [vmem:[#allocation10 + $0x188] ss:$16 sps:$4 sm:$0xff]  }
 0x467   :  { %3140 = vmatprep.subr.bf16.mxu1 %v5198_v2  ;;  %v5285_v2 = vld [vmem:[#allocation10 + $0x1a4] ss:$16 sps:$4 sm:$0xff]  }
 0x469   :  { %3018 = vmatpush1.bf16.msra.mxu0 %v5193_v21  ;;  %v5288_v21 = vld [vmem:[#allocation10 + $0x1ac] ss:$16 sps:$4 sm:$0xff]  }
 0x46a   :  { %3141 = vmatpush1.bf16.msra.mxu1 %v5196_v4  ;;  %3019 = vmatprep.subr.bf16.mxu0 %v5201_v60  ;;  %v5283_v4 = vld [vmem:[#allocation10 + $0x1a0] ss:$16 sps:$4 sm:$0xff]   ;;  %v5286_v60 = vld [vmem:[#allocation10 + $0x1a8] ss:$16 sps:$4 sm:$0xff]  }
 0x46b   :  { %3142 = vmatprep.subr.bf16.mxu1 %v5204_v42  ;;  %v5291_v42 = vld [vmem:[#allocation10 + $0x1c4] ss:$16 sps:$4 sm:$0xff]  }
 0x46d   :  { %3020 = vmatpush1.bf16.msra.mxu0 %v5199_v61  ;;  %v5294_v61 = vld [vmem:[#allocation10 + $0x1cc] ss:$16 sps:$4 sm:$0xff]  }
 0x46e   :  { %3143 = vmatpush1.bf16.msra.mxu1 %v5202_v47  ;;  %3951 = vmatprep.subr.bf16.mxu0 %v5207_v5  ;;  %v5289_v47 = vld [vmem:[#allocation10 + $0x1c0] ss:$16 sps:$4 sm:$0xff]   ;;  %v5292_v5 = vld [vmem:[#allocation10 + $0x1c8] ss:$16 sps:$4 sm:$0xff]  }
 0x46f   :  { %4033 = vmatprep.subr.bf16.mxu1 %v5210_v48  ;;  %v5297_v48 = vld [vmem:[#allocation10 + $0x1e4] ss:$16 sps:$4 sm:$0xff]  }
 0x470   :  { %3022 = vmatmul.mubr.bf16.vlgmr.msra.gmra.mrb[24].mxu0 %v4655_v6 }
 0x471   :  { %3145 = vmatmul.mubr.bf16.vlgmr.msra.gmra.mrb[52].mxu1 %v4655_v6  ;;  %3952 = vmatpush1.bf16.msra.mxu0 %v5205_v63  ;;  %v5300_v63 = vld [vmem:[#allocation10 + $0x1ec] ss:$16 sps:$4 sm:$0xff]   ;;  %v5295_v6 = vld [vmem:[#allocation10 + $0x1e0] ss:$16 sps:$4 sm:$0xff]  }
 0x472   :  { %4034 = vmatpush1.bf16.msra.mxu1 %v5208_v37  ;;  %3953 = vmatprep.subr.bf16.mxu0 %v5213_v8  ;;  %v5298_v37 = vld [vmem:[#allocation10 + $0x1e8] ss:$16 sps:$4 sm:$0xff]   ;;  %v5303_v8 = vld [vmem:[#allocation10 + $0x204] ss:$16 sps:$4 sm:$0xff]  }
 0x473   :  { %4035 = vmatprep.subr.bf16.mxu1 %v5216_v50  ;;  %v5306_v50 = vld [vmem:[#allocation10 + $0x20c] ss:$16 sps:$4 sm:$0xff]  }
 0x475   :  { %3954 = vmatpush1.bf16.msra.mxu0 %v5211_v3  ;;  %v5879_v3 = vld [vmem:[%s5923_s12] sm:$0xf] }
 0x476   :  { %4036 = vmatpush1.bf16.msra.mxu1 %v5214_v9  ;;  %3955 = vmatprep.subr.bf16.mxu0 %v5219_v10  ;;  %v1909_v9 = vrot.slane %v5879_v3, %v5701_v24  ;;  %v1913_v10 = vrot.slane %v5879_v3, %v5707_v27 }
 0x477   :  { %4037 = vmatprep.subr.bf16.mxu1 %v5222_v12  ;;  %v1921_v12 = vrot.slane %v5879_v3, %v5787_v43 }
 0x479   :  { %3956 = vmatpush1.bf16.msra.mxu0 %v5217_v13 }
 0x47a   :  { %4038 = vmatpush1.bf16.msra.mxu1 %v5220_v11  ;;  %3957 = vmatprep.subr.bf16.mxu0 %v5225_v14 }
 0x47b   :  { %4039 = vmatprep.subr.bf16.mxu1 %v5228_v15 }
 0x47d   :  { %3958 = vmatpush1.bf16.msra.mxu0 %v5223_v7 }
 0x47e   :  { %4040 = vmatpush1.bf16.msra.mxu1 %v5226_v16  ;;  %3959 = vmatprep.subr.bf16.mxu0 %v5231_v49 }
 0x47f   :  { %4041 = vmatprep.subr.bf16.mxu1 %v5234_v17 }
 0x481   :  { %3960 = vmatpush1.bf16.msra.mxu0 %v5229_v51 }
 0x482   :  { %4042 = vmatpush1.bf16.msra.mxu1 %v5232_v18  ;;  %3961 = vmatprep.subr.bf16.mxu0 %v5237_v19 }
 0x483   :  { %4043 = vmatprep.subr.bf16.mxu1 %v5240_v52 }
 0x485   :  { %3962 = vmatpush1.bf16.msra.mxu0 %v5235_v20 }
 0x486   :  { %4044 = vmatpush1.bf16.msra.mxu1 %v5238_v22  ;;  %3963 = vmatprep.subr.bf16.mxu0 %v5243_v23 }
 0x487   :  { %4045 = vmatprep.subr.bf16.mxu1 %v5246_v25  ;;  %v5301_v25 = vld [vmem:[#allocation10 + $0x200] ss:$16 sps:$4 sm:$0xff]  }
 0x489   :  { %3964 = vmatpush1.bf16.msra.mxu0 %v5241_v26  ;;  %v5304_v26 = vld [vmem:[#allocation10 + $0x208] ss:$16 sps:$4 sm:$0xff]  }
 0x48a   :  { %4046 = vmatpush1.bf16.msra.mxu1 %v5244_v28  ;;  %3965 = vmatprep.subr.bf16.mxu0 %v5249_v29  ;;  %v5309_v29 = vld [vmem:[#allocation10 + $0x224] ss:$16 sps:$4 sm:$0xff]  }
 0x48b   :  { %4047 = vmatprep.subr.bf16.mxu1 %v5252_v0  ;;  %v5312_v0 = vld [vmem:[#allocation10 + $0x22c] ss:$16 sps:$4 sm:$0xff]  }
 0x48d   :  { %3966 = vmatpush1.bf16.msra.mxu0 %v5247_v30 }
 0x48e   :  { %4048 = vmatpush1.bf16.msra.mxu1 %v5250_v31  ;;  %3967 = vmatprep.subr.bf16.mxu0 %v5255_v32  ;;  %v5307_v31 = vld [vmem:[#allocation10 + $0x220] ss:$16 sps:$4 sm:$0xff]   ;;  %v5310_v32 = vld [vmem:[#allocation10 + $0x228] ss:$16 sps:$4 sm:$0xff]  }
 0x48f   :  { %4049 = vmatprep.subr.bf16.mxu1 %v5258_v33  ;;  %v5315_v33 = vld [vmem:[#allocation10 + $0x244] ss:$16 sps:$4 sm:$0xff]  }
 0x491   :  { %3968 = vmatpush1.bf16.msra.mxu0 %v5253_v34  ;;  %v5318_v34 = vld [vmem:[#allocation10 + $0x24c] ss:$16 sps:$4 sm:$0xff]  }
 0x492   :  { %4050 = vmatpush1.bf16.msra.mxu1 %v5256_v35  ;;  %3969 = vmatprep.subr.bf16.mxu0 %v5261_v36  ;;  %v5313_v35 = vld [vmem:[#allocation10 + $0x240] ss:$16 sps:$4 sm:$0xff]   ;;  %v5316_v36 = vld [vmem:[#allocation10 + $0x248] ss:$16 sps:$4 sm:$0xff]  }
 0x493   :  { %4051 = vmatprep.subr.bf16.mxu1 %v5264_v38  ;;  %v5321_v38 = vld [vmem:[#allocation10 + $0x264] ss:$16 sps:$4 sm:$0xff]  }
 0x495   :  { %3970 = vmatpush1.bf16.msra.mxu0 %v5259_v39  ;;  %v5324_v39 = vld [vmem:[#allocation10 + $0x26c] ss:$16 sps:$4 sm:$0xff]  }
 0x496   :  { %4052 = vmatpush1.bf16.msra.mxu1 %v5262_v40  ;;  %3971 = vmatprep.subr.bf16.mxu0 %v5267_v44  ;;  %v5319_v40 = vld [vmem:[#allocation10 + $0x260] ss:$16 sps:$4 sm:$0xff]   ;;  %v5322_v44 = vld [vmem:[#allocation10 + $0x268] ss:$16 sps:$4 sm:$0xff]  }
 0x497   :  { %4053 = vmatprep.subr.bf16.mxu1 %v5270_v45  ;;  %v5327_v45 = vld [vmem:[#allocation10 + $0x284] ss:$16 sps:$4 sm:$0xff]  }
 0x499   :  { %3972 = vmatpush1.bf16.msra.mxu0 %v5265_v46  ;;  %v5330_v46 = vld [vmem:[#allocation10 + $0x28c] ss:$16 sps:$4 sm:$0xff]  }
 0x49a   :  { %4054 = vmatpush1.bf16.msra.mxu1 %v5268_v53  ;;  %3973 = vmatprep.subr.bf16.mxu0 %v5273_v54  ;;  %v5325_v53 = vld [vmem:[#allocation10 + $0x280] ss:$16 sps:$4 sm:$0xff]   ;;  %v5328_v54 = vld [vmem:[#allocation10 + $0x288] ss:$16 sps:$4 sm:$0xff]  }
 0x49b   :  { %4055 = vmatprep.subr.bf16.mxu1 %v5276_v55  ;;  %v5333_v55 = vld [vmem:[#allocation10 + $0x2a4] ss:$16 sps:$4 sm:$0xff]  }
 0x49d   :  { %3974 = vmatpush1.bf16.msra.mxu0 %v5271_v56  ;;  %v5336_v56 = vld [vmem:[#allocation10 + $0x2ac] ss:$16 sps:$4 sm:$0xff]  }
 0x49e   :  { %4056 = vmatpush1.bf16.msra.mxu1 %v5274_v57  ;;  %3975 = vmatprep.subr.bf16.mxu0 %v5279_v58  ;;  %v5331_v57 = vld [vmem:[#allocation10 + $0x2a0] ss:$16 sps:$4 sm:$0xff]   ;;  %v5334_v58 = vld [vmem:[#allocation10 + $0x2a8] ss:$16 sps:$4 sm:$0xff]  }
 0x49f   :  { %4057 = vmatprep.subr.bf16.mxu1 %v5282_v59  ;;  %v5339_v59 = vld [vmem:[#allocation10 + $0x2c4] ss:$16 sps:$4 sm:$0xff]  }
 0x4a1   :  { %3976 = vmatpush1.bf16.msra.mxu0 %v5277_v62  ;;  %v5342_v62 = vld [vmem:[#allocation10 + $0x2cc] ss:$16 sps:$4 sm:$0xff]  }
 0x4a2   :  { %4058 = vmatpush1.bf16.msra.mxu1 %v5280_v1  ;;  %3977 = vmatprep.subr.bf16.mxu0 %v5285_v2  ;;  %v5337_v1 = vld [vmem:[#allocation10 + $0x2c0] ss:$16 sps:$4 sm:$0xff]   ;;  %v5340_v2 = vld [vmem:[#allocation10 + $0x2c8] ss:$16 sps:$4 sm:$0xff]  }
 0x4a3   :  { %4059 = vmatprep.subr.bf16.mxu1 %v5288_v21  ;;  %v5345_v21 = vld [vmem:[#allocation10 + $0x2e4] ss:$16 sps:$4 sm:$0xff]  }
 0x4a5   :  { %3978 = vmatpush1.bf16.msra.mxu0 %v5283_v4  ;;  %v5348_v4 = vld [vmem:[#allocation10 + $0x2ec] ss:$16 sps:$4 sm:$0xff]  }
 0x4a6   :  { %4060 = vmatpush1.bf16.msra.mxu1 %v5286_v60  ;;  %3979 = vmatprep.subr.bf16.mxu0 %v5291_v42  ;;  %v5343_v60 = vld [vmem:[#allocation10 + $0x2e0] ss:$16 sps:$4 sm:$0xff]   ;;  %v5346_v42 = vld [vmem:[#allocation10 + $0x2e8] ss:$16 sps:$4 sm:$0xff]  }
 0x4a7   :  { %4061 = vmatprep.subr.bf16.mxu1 %v5294_v61  ;;  %v5351_v61 = vld [vmem:[#allocation10 + $0x304] ss:$16 sps:$4 sm:$0xff]  }
 0x4a9   :  { %3980 = vmatpush1.bf16.msra.mxu0 %v5289_v47  ;;  %v5354_v47 = vld [vmem:[#allocation10 + $0x30c] ss:$16 sps:$4 sm:$0xff]  }
 0x4aa   :  { %4062 = vmatpush1.bf16.msra.mxu1 %v5292_v5  ;;  %3981 = vmatprep.subr.bf16.mxu0 %v5297_v48  ;;  %v5349_v5 = vld [vmem:[#allocation10 + $0x300] ss:$16 sps:$4 sm:$0xff]   ;;  %v5352_v48 = vld [vmem:[#allocation10 + $0x308] ss:$16 sps:$4 sm:$0xff]  }
 0x4ab   :  { %4063 = vmatprep.subr.bf16.mxu1 %v5300_v63  ;;  %v5357_v63 = vld [vmem:[#allocation10 + $0x324] ss:$16 sps:$4 sm:$0xff]  }
 0x4ad   :  { %3982 = vmatpush1.bf16.msra.mxu0 %v5295_v6  ;;  %v5360_v6 = vld [vmem:[#allocation10 + $0x32c] ss:$16 sps:$4 sm:$0xff]  }
 0x4ae   :  { %4064 = vmatpush1.bf16.msra.mxu1 %v5298_v37  ;;  %3992 = vmatprep.subr.bf16.mxu0 %v5303_v8  ;;  %v5355_v37 = vld [vmem:[#allocation10 + $0x320] ss:$16 sps:$4 sm:$0xff]   ;;  %v5358_v8 = vld [vmem:[#allocation10 + $0x328] ss:$16 sps:$4 sm:$0xff]  }
 0x4af   :  { %4074 = vmatprep.subr.bf16.mxu1 %v5306_v50  ;;  %v5363_v50 = vld [vmem:[#allocation10 + $0x344] ss:$16 sps:$4 sm:$0xff]  }
 0x543   :  { %v3023_v13 = vpop.f32.mrb[24].mxu0 }
 0x544   :  { %v4703_v11 = vadd.f32 %v3023_v13, %v1909_v9  ;;  %v5887_v14 = vpop.f32.mrb[52].mxu1  ;;  %v3025_v15 = vpop.f32.mrb[25].mxu0  ;;  %v5366_v9 = vld [vmem:[#allocation10 + $0x34c] ss:$16 sps:$4 sm:$0xff]   ;;  %v5369_v13 = vld [vmem:[#allocation10 + $0x364] ss:$16 sps:$4 sm:$0xff]  }
 0x545   :  { %v4704_v7 = vadd.f32 %v3025_v15, %v1913_v10  ;;  %v3148_v16 = vpop.f32.mrb[53].mxu1  ;;  %v3027_v49 = vpop.f32.mrb[26].mxu0  ;;  %v5361_v10 = vld [vmem:[#allocation10 + $0x340] ss:$16 sps:$4 sm:$0xff]  }
 0x546   :  { %v3153_v17 = vmax.f32 %v4703_v11, 0.0  ;;  %v4706_v51 = vadd.f32 %v3148_v16, %v1921_v12  ;;  %v3150_v18 = vpop.f32.mrb[54].mxu1  ;;  %v3028_v19 = vpop.f32.mrb[27].mxu0  ;;  %v5364_v12 = vld [vmem:[#allocation10 + $0x348] ss:$16 sps:$4 sm:$0xff]  }
 0x547   :  { %v3154_v52 = vmax.f32 %v4704_v7, 0.0  ;;  %v3151_v20 = vpop.f32.mrb[55].mxu1  ;;  %v5372_v11 = vld [vmem:[#allocation10 + $0x36c] ss:$16 sps:$4 sm:$0xff]   ;;  %v5367_v15 = vld [vmem:[#allocation10 + $0x360] ss:$16 sps:$4 sm:$0xff]  }
 0x548   :  { %v3156_v22 = vmax.f32 %v4706_v51, 0.0  ;;  %v3157_v28 = vpack.c.bf16 %v3153_v17, %v3153_v17  ;;  %v5370_v7 = vld [vmem:[#allocation10 + $0x368] ss:$16 sps:$4 sm:$0xff]   ;;  %v5375_v16 = vld [vmem:[#allocation10 + $0x384] ss:$16 sps:$4 sm:$0xff]  }
 0x549   :  { %v3158_v23 = vpack.c.bf16 %v3154_v52, %v3154_v52  ;;  %v5378_v49 = vld [vmem:[#allocation10 + $0x38c] ss:$16 sps:$4 sm:$0xff]   ;;  %v5373_v17 = vld [vmem:[#allocation10 + $0x380] ss:$16 sps:$4 sm:$0xff]   ;;  %v5376_v51 = vld [vmem:[#allocation10 + $0x388] ss:$16 sps:$4 sm:$0xff]  }
 0x54a   :  { %v3160_v30 = vpack.c.bf16 %v3156_v22, %v3156_v22  ;;  %v5381_v18 = vld [vmem:[#allocation10 + $0x3a4] ss:$16 sps:$4 sm:$0xff]   ;;  %v5384_v19 = vld [vmem:[#allocation10 + $0x3ac] ss:$16 sps:$4 sm:$0xff]   ;;  %v5379_v52 = vld [vmem:[#allocation10 + $0x3a0] ss:$16 sps:$4 sm:$0xff]   ;;  %v1917_v22 = vrot.slane %v5879_v3, %v5779_v41 }
 0x54b   :  { %3983 = vmatprep.mubr.bf16.mxu0 %v3158_v23  ;;  %4065 = vmatprep.mubr.bf16.mxu1 %v3158_v23  ;;  %v5382_v20 = vld [vmem:[#allocation10 + $0x3a8] ss:$16 sps:$4 sm:$0xff]   ;;  %v5387_v23 = vld [vmem:[#allocation10 + $0x3c4] ss:$16 sps:$4 sm:$0xff]  }
 0x54c   :  { %3984 = vmatmul.mubr.bf16.vlgmr.msra.gmra.mrb[28].mxu0 %v3157_v28  ;;  %4066 = vmatmul.mubr.bf16.vlgmr.msra.gmra.mrb[56].mxu1 %v3157_v28  ;;  %v5388_v28 = vld [vmem:[#allocation10 + $0x3c8] ss:$16 sps:$4 sm:$0xff]  }
 0x54d   :  { %3993 = vmatpush1.bf16.msra.mxu0 %v5301_v25  ;;  %4075 = vmatpush1.bf16.msra.mxu1 %v5304_v26  ;;  %v5390_v25 = vld [vmem:[#allocation10 + $0x3cc] ss:$16 sps:$4 sm:$0xff]   ;;  %v5385_v26 = vld [vmem:[#allocation10 + $0x3c0] ss:$16 sps:$4 sm:$0xff]  }
 0x54e   :  { %4024 = vmatprep.mubr.bf16.mxu0 %v3160_v30  ;;  %4106 = vmatprep.mubr.bf16.mxu1 %v3160_v30  ;;  %v5396_v30 = vld [vmem:[#allocation10 + $0x3ec] ss:$16 sps:$4 sm:$0xff]  }
 0x54f   :  { %3994 = vmatprep.subr.bf16.mxu0 %v5309_v29  ;;  %4076 = vmatprep.subr.bf16.mxu1 %v5312_v0  ;;  %v4705_v29 = vadd.f32 %v5887_v14, %v1917_v22  ;;  %v5393_v0 = vld [vmem:[#allocation10 + $0x3e4] ss:$16 sps:$4 sm:$0xff]   ;;  %v3289_v14 = vld [vmem:[%s5925_s14] sm:$0xf]  ;;  %s5487_s14 = scalar_lea.vmem %s4126_s9, 512 }
 0x550   :  { %p5488_p10 = scmp.ne.s32.totalorder %s4126_s9, %s5487_s14  ;;  %p5493_p12 = scmp.lt.s32.totalorder %s5487_s14, %s5487_s14 }
 0x551   :  { %3995 = vmatpush1.bf16.msra.mxu0 %v5307_v31  ;;  %4077 = vmatpush1.bf16.msra.mxu1 %v5310_v32  ;;  %v5391_v31 = vld [vmem:[#allocation10 + $0x3e0] ss:$16 sps:$4 sm:$0xff]   ;;  %v5394_v32 = vld [vmem:[#allocation10 + $0x3e8] ss:$16 sps:$4 sm:$0xff]  }
 0x552   :  { %3996 = vmatprep.subr.bf16.mxu0 %v5315_v33  ;;  %4078 = vmatprep.subr.bf16.mxu1 %v5318_v34  ;;  %v3155_v33 = vmax.f32 %v4705_v29, 0.0  ;;  %v3294_v34 = vrot.slane %v3289_v14, %v5701_v24  ;;  %p5494_p13 = por %p5493_p12, %p5492_p11 }
 0x554   :  { %v3159_v3 = vpack.c.bf16 %v3155_v33, %v3155_v33  ;;  %p5495_p0 = pnand %p5494_p13, %p5488_p10 }
 0x555   :  { %3997 = vmatpush1.bf16.msra.mxu0 %v5313_v35  ;;  %4079 = vmatpush1.bf16.msra.mxu1 %v5316_v36  ;;  %v3302_v35 = vrot.slane %v3289_v14, %v5779_v41  ;;  %v3298_v36 = vrot.slane %v3289_v14, %v5707_v27 }
 0x556   :  { %3998 = vmatprep.subr.bf16.mxu0 %v5321_v38  ;;  %4080 = vmatprep.subr.bf16.mxu1 %v5324_v39  ;;  %v3306_v38 = vrot.slane %v3289_v14, %v5787_v43 }
 0x559   :  { %3999 = vmatpush1.bf16.msra.mxu0 %v5319_v40  ;;  %4081 = vmatpush1.bf16.msra.mxu1 %v5322_v44 }
 0x55a   :  { %4000 = vmatprep.subr.bf16.mxu0 %v5327_v45  ;;  %4082 = vmatprep.subr.bf16.mxu1 %v5330_v46 }
 0x55d   :  { %4001 = vmatpush1.bf16.msra.mxu0 %v5325_v53  ;;  %4083 = vmatpush1.bf16.msra.mxu1 %v5328_v54 }
 0x55e   :  { %4002 = vmatprep.subr.bf16.mxu0 %v5333_v55  ;;  %4084 = vmatprep.subr.bf16.mxu1 %v5336_v56 }
 0x561   :  { %4003 = vmatpush1.bf16.msra.mxu0 %v5331_v57  ;;  %4085 = vmatpush1.bf16.msra.mxu1 %v5334_v58 }
 0x562   :  { %4004 = vmatprep.subr.bf16.mxu0 %v5339_v59  ;;  %4086 = vmatprep.subr.bf16.mxu1 %v5342_v62 }
 0x565   :  { %4005 = vmatpush1.bf16.msra.mxu0 %v5337_v1  ;;  %4087 = vmatpush1.bf16.msra.mxu1 %v5340_v2 }
 0x566   :  { %4006 = vmatprep.subr.bf16.mxu0 %v5345_v21  ;;  %4088 = vmatprep.subr.bf16.mxu1 %v5348_v4 }
 0x569   :  { %4007 = vmatpush1.bf16.msra.mxu0 %v5343_v60  ;;  %4089 = vmatpush1.bf16.msra.mxu1 %v5346_v42 }
 0x56a   :  { %4008 = vmatprep.subr.bf16.mxu0 %v5351_v61  ;;  %4090 = vmatprep.subr.bf16.mxu1 %v5354_v47 }
 0x56d   :  { %4009 = vmatpush1.bf16.msra.mxu0 %v5349_v5  ;;  %4091 = vmatpush1.bf16.msra.mxu1 %v5352_v48 }
 0x56e   :  { %4010 = vmatprep.subr.bf16.mxu0 %v5357_v63  ;;  %4092 = vmatprep.subr.bf16.mxu1 %v5360_v6 }
 0x571   :  { %4011 = vmatpush1.bf16.msra.mxu0 %v5355_v37  ;;  %4093 = vmatpush1.bf16.msra.mxu1 %v5358_v8 }
 0x572   :  { %4012 = vmatprep.subr.bf16.mxu0 %v5363_v50  ;;  %4094 = vmatprep.subr.bf16.mxu1 %v5366_v9 }
 0x575   :  { %4013 = vmatpush1.bf16.msra.mxu0 %v5361_v10  ;;  %4095 = vmatpush1.bf16.msra.mxu1 %v5364_v12 }
 0x576   :  { %4014 = vmatprep.subr.bf16.mxu0 %v5369_v13  ;;  %4096 = vmatprep.subr.bf16.mxu1 %v5372_v11 }
 0x579   :  { %4015 = vmatpush1.bf16.msra.mxu0 %v5367_v15  ;;  %4097 = vmatpush1.bf16.msra.mxu1 %v5370_v7 }
 0x57a   :  { %4016 = vmatprep.subr.bf16.mxu0 %v5375_v16  ;;  %4098 = vmatprep.subr.bf16.mxu1 %v5378_v49 }
 0x57d   :  { %4017 = vmatpush1.bf16.msra.mxu0 %v5373_v17  ;;  %4099 = vmatpush1.bf16.msra.mxu1 %v5376_v51 }
 0x57e   :  { %4018 = vmatprep.subr.bf16.mxu0 %v5381_v18  ;;  %4100 = vmatprep.subr.bf16.mxu1 %v5384_v19 }
 0x581   :  { %4019 = vmatpush1.bf16.msra.mxu0 %v5379_v52  ;;  %4101 = vmatpush1.bf16.msra.mxu1 %v5382_v20 }
 0x582   :  { %4020 = vmatprep.subr.bf16.mxu0 %v5387_v23  ;;  %4102 = vmatprep.subr.bf16.mxu1 %v5390_v25 }
 0x585   :  { %4021 = vmatpush1.bf16.msra.mxu0 %v5385_v26  ;;  %4103 = vmatpush1.bf16.msra.mxu1 %v5388_v28 }
 0x586   :  { %4022 = vmatprep.subr.bf16.mxu0 %v5393_v0  ;;  %4104 = vmatprep.subr.bf16.mxu1 %v5396_v30 }
 0x589   :  { %4023 = vmatpush1.bf16.msra.mxu0 %v5391_v31  ;;  %4105 = vmatpush1.bf16.msra.mxu1 %v5394_v32 }
 0x58c   :  { %4025 = vmatmul.mubr.bf16.vlgmr.msra.gmra.mrb[28].mxu0 %v3159_v3  ;;  %4107 = vmatmul.mubr.bf16.vlgmr.msra.gmra.mrb[56].mxu1 %v3159_v3 }
 0x65f   :  { %v4026_v39 = vpop.f32.mrb[28].mxu0  ;;  %v4108_v40 = vpop.f32.mrb[56].mxu1 }
 0x660   :  { %v4707_v44 = vadd.f32 %v4026_v39, %v3294_v34  ;;  %v4709_v45 = vadd.f32 %v4108_v40, %v3302_v35  ;;  %v4028_v46 = vpop.f32.mrb[29].mxu0  ;;  %v4110_v53 = vpop.f32.mrb[57].mxu1 }
 0x661   :  { %v4708_v54 = vadd.f32 %v4028_v46, %v3298_v36  ;;  %v4710_v55 = vadd.f32 %v4110_v53, %v3306_v38  ;;  %v4030_v56 = vpop.f32.mrb[30].mxu0  ;;  %v4112_v57 = vpop.f32.mrb[58].mxu1 }
 0x662   :  { %4115 = vst [vmem:[#allocation11] sm:$0xff] %v4707_v44  ;;  %4117 = vst [vmem:[#allocation11 + $0x10] sm:$0xff] %v4709_v45  ;;  %v4031_v24 = vpop.f32.mrb[31].mxu0  ;;  %v4113_v41 = vpop.f32.mrb[59].mxu1 }
 0x663   :  { %4116 = vst [vmem:[#allocation11 + $0x8] sm:$0xff] %v4708_v54  ;;  %4118 = vst [vmem:[#allocation11 + $0x18] sm:$0xff] %v4710_v55 }
 0x664   :  { %5498 = shalt.err (!%p5495_p0)
}
 0x665   :  { %s5499_s11 = scalar_lea.hbm %s5928_s17, 512 }
 0x666   :  { %p5500_p1 = scmp.ne.s32.totalorder %s5928_s17, %s5499_s11  ;;  %p5503_p2 = scmp.lt.u32.totalorder %s5499_s11, %s5928_s17 }
 0x668   :  { %p5505_p3 = pnand %p5503_p2, %p5500_p1 }
 0x66a   :  { %5508 = shalt.err (!%p5505_p3)
}
 0x66b   :  { %4128 = dma.vmem_to_hbm [thread:$0]  %s4126_s9, 512, %s5928_s17, [#allocation7]  }
 0x66c   :  { %5513 = dma.done.wait [#allocation7], 512  }
 0x66d   :  { %5514 = vsyncadd [#allocation7], 4294966784 }
 0x66e   :  { %4132 = vsyncpa [#allocation6], 1 }
 0x66f   :  { %4133 = vsyncpa [#allocation9], 1 }
 0x670   :  { %4134 = vsyncpa [#allocation7], 1 }

</bundles_post_ra>
